<compile_context>
chip_gen: v5e
topology: v5e:2x2
jax: 0.10.0
libtpu: 0.0.40
codegen_flags: <defaults>
</compile_context>

<pallas_src>
import numpy as np
import jax
import jax.numpy as jnp
from jax.experimental import pallas as pl
from jax.experimental.pallas import tpu as pltpu

ALPHA = 0.25          # focal alpha
BETA = 1.0 / 9.0      # smooth-L1 change point
NEG_INF = -1e30


def _pick_lane_tile(n, max_tile):
    """Largest lane tile that divides n and is a multiple of 128, else n."""
    if n <= max_tile:
        return n
    t = (max_tile // 128) * 128
    while t >= 128:
        if n % t == 0:
            return t
        t -= 128
    # TODO(synk): pad+mask path for lane dims with no multiple-of-128 divisor.
    return n


# ---------------------------------------------------------------------------
# Kernel 1: focal classification loss + weighted smooth-L1 regression loss.
# Emits UN-normalised per-batch partial sums; /pos_norm, /B, loss weights are
# applied in glue.
# ---------------------------------------------------------------------------
def _det_kernel(cls_ref, lab_ref, rm_ref, tg_ref, cls_out, reg_out, pos_out):
    @pl.when(pl.program_id(1) == 0)
    def _():
        cls_out[...] = jnp.zeros_like(cls_out)
        reg_out[...] = jnp.zeros_like(reg_out)
        pos_out[...] = jnp.zeros_like(pos_out)

    lab = lab_ref[...]                       # (1, A, T) float 0/1
    x = cls_ref[...]                         # (1, A, T) cls logits
    pos = (lab > 0).astype(jnp.float32)
    neg = (lab == 0).astype(jnp.float32)
    cls_w = neg + pos                        # un-normalised anchor weights

    # one-hot class-1 slot (torch scatter_ on labels.long())
    t = (lab.astype(jnp.int32) == 1).astype(jnp.float32)
    p = jax.nn.sigmoid(x)
    alpha_w = t * ALPHA + (1.0 - t) * (1.0 - ALPHA)
    pt = t * (1.0 - p) + (1.0 - t) * p
    bce = jnp.maximum(x, 0.0) - x * t + jnp.log(1.0 + jnp.exp(-jnp.abs(x)))
    cls_out[...] += jnp.sum(alpha_w * pt * pt * bce * cls_w)
    pos_out[...] += jnp.sum(pos)

    # ---- regression: codes 0..5 plain smooth-L1; code 6 sin-difference ----
    rm = rm_ref[...]                         # (1, A, 7, T)
    tg = tg_ref[...]                         # (1, A, 7, T)
    w = pos[:, :, None, :]                   # (1, A, 1, T) anchor weights

    rm_o = rm[:, :, 0:6, :]
    tg_o = tg[:, :, 0:6, :]
    tg_o = jnp.where(jnp.isnan(tg_o), rm_o, tg_o)     # nan targets -> pred
    n_o = jnp.abs(rm_o - tg_o)
    sl1_o = jnp.where(n_o < BETA, 0.5 * n_o * n_o / BETA, n_o - 0.5 * BETA)
    reg_sum = jnp.sum(sl1_o * w)

    rm6 = rm[:, :, 6:7, :]
    tg6 = tg[:, :, 6:7, :]
    rm_y = jnp.sin(rm6) * jnp.cos(tg6)
    tg_y = jnp.cos(rm6) * jnp.sin(tg6)
    tg_y = jnp.where(jnp.isnan(tg_y), rm_y, tg_y)
    n_y = jnp.abs(rm_y - tg_y)
    sl1_y = jnp.where(n_y < BETA, 0.5 * n_y * n_y / BETA, n_y - 0.5 * BETA)
    reg_sum += jnp.sum(sl1_y * w)

    reg_out[...] += reg_sum


def _det_partial_sums(psm_r, lab_t, rm_r4, tg_r4, tile_p):
    """psm_r/lab_t: (B, A, HW), rm_r4/tg_r4: (B, A, 7, HW)."""
    B, A, HW = psm_r.shape
    T = _pick_lane_tile(HW, tile_p)
    n_t = HW // T

    out_spec = pl.BlockSpec((1, 1, 1), lambda b, t: (b, 0, 0))
    cls_s, reg_s, pos_s = pl.pallas_call(
        _det_kernel,
        out_shape=(jax.ShapeDtypeStruct((B, 1, 1), jnp.float32),
                   jax.ShapeDtypeStruct((B, 1, 1), jnp.float32),
                   jax.ShapeDtypeStruct((B, 1, 1), jnp.float32)),
        grid=(B, n_t),
        in_specs=[
            pl.BlockSpec((1, A, T), lambda b, t: (b, 0, t)),
            pl.BlockSpec((1, A, T), lambda b, t: (b, 0, t)),
            pl.BlockSpec((1, A, 7, T), lambda b, t: (b, 0, 0, t)),
            pl.BlockSpec((1, A, 7, T), lambda b, t: (b, 0, 0, t)),
        ],
        out_specs=(out_spec, out_spec, out_spec),
        compiler_params=pltpu.CompilerParams(
            dimension_semantics=("parallel", "arbitrary")),
    )(psm_r, lab_t, rm_r4, tg_r4)
    return cls_s.reshape(B), reg_s.reshape(B), pos_s.reshape(B)


# ---------------------------------------------------------------------------
# Kernel 2: per-pixel cross entropy over C = H*W+1 classes (grid loss),
# streamed in class chunks with an online logsumexp in native NCHW layout.
# ---------------------------------------------------------------------------
def _make_grid_ce_kernel(c_total, c_tile):
    def kernel(corr_ref, gt_ref, out_ref, m_sc, s_sc, sel_sc):
        ct = pl.program_id(2)

        @pl.when(ct == 0)
        def _():
            m_sc[...] = jnp.full_like(m_sc, NEG_INF)
            s_sc[...] = jnp.zeros_like(s_sc)
            sel_sc[...] = jnp.zeros_like(sel_sc)
            out_ref[...] = jnp.zeros_like(out_ref)

        logits = corr_ref[...]                       # (1, C_T, P_T) float32
        gt = gt_ref[...]                             # (1, 1, P_T)   int32
        c_idx = ct * c_tile + jax.lax.broadcasted_iota(
            jnp.int32, logits.shape, 1)
        # mask classes past the real class count (partial last chunk)
        x = jnp.where(c_idx < c_total, logits, NEG_INF)

        m_prev = m_sc[...]                           # (1, P_T)
        m_new = jnp.maximum(m_prev, jnp.max(x, axis=1))
        scale = jnp.exp(m_prev - m_new)
        e = jnp.exp(x - m_new[:, None, :])
        s_sc[...] = s_sc[...] * scale + jnp.sum(e, axis=1)
        m_sc[...] = m_new
        # selected logit (gt always < c_total, so only real classes match)
        sel_sc[...] += jnp.sum(jnp.where(c_idx == gt, x, 0.0), axis=1)

        @pl.when(ct == pl.num_programs(2) - 1)
        def _():
            ce = m_sc[...] + jnp.log(s_sc[...]) - sel_sc[...]   # (1, P_T)
            out_ref[...] = jnp.sum(ce).reshape(1, 1, 1, 1)

    return kernel


def _grid_ce_sum(corr_r, gt_r, tile_p, tile_c):
    """corr_r: (N_, C, HW) float32, gt_r: (N_, 1, HW) int32 -> scalar sum."""
    N_, C, HW = corr_r.shape
    P_T = _pick_lane_tile(HW, tile_p)
    n_pt = HW // P_T
    C_T = C if C <= tile_c else (tile_c // 8) * 8
    n_ct = pl.cdiv(C, C_T)

    out = pl.pallas_call(
        _make_grid_ce_kernel(C, C_T),
        out_shape=jax.ShapeDtypeStruct((N_, n_pt, 1, 1), jnp.float32),
        grid=(N_, n_pt, n_ct),
        in_specs=[
            pl.BlockSpec((1, C_T, P_T), lambda n, p, c: (n, c, p)),
            pl.BlockSpec((1, 1, P_T), lambda n, p, c: (n, 0, p)),
        ],
        out_specs=pl.BlockSpec((1, 1, 1, 1), lambda n, p, c: (n, p, 0, 0)),
        scratch_shapes=[
            pltpu.VMEM((1, P_T), jnp.float32),
            pltpu.VMEM((1, P_T), jnp.float32),
            pltpu.VMEM((1, P_T), jnp.float32),
        ],
        compiler_params=pltpu.CompilerParams(
            dimension_semantics=("parallel", "parallel", "arbitrary")),
    )(corr_r, gt_r)
    return jnp.sum(out)


# ---------------------------------------------------------------------------
# affine_grid / record_len bookkeeping (tiny, plain-JAX glue)
# ---------------------------------------------------------------------------
def _affine_grid_idx(pairwise_t_matrix, record_len, H, W,
                     downsample_rate, discrete_ratio):
    record_len = np.asarray(record_len)
    B = int(record_len.shape[0])
    dsr = float(downsample_rate) * float(discrete_ratio)

    tmat = jnp.take(pairwise_t_matrix[:, :, :, 0:2, :],
                    jnp.array([0, 1, 3]), axis=-1)            # (B, L, L, 2, 3)
    tmat = tmat.at[..., 0, 1].set(tmat[..., 0, 1] * H / W)
    tmat = tmat.at[..., 1, 0].set(tmat[..., 1, 0] * W / H)
    tmat = tmat.at[..., 0, 2].set(tmat[..., 0, 2] / (dsr * W) * 2)
    tmat = tmat.at[..., 1, 2].set(tmat[..., 1, 2] / (dsr * H) * 2)

    t_list = []
    for b in range(B):
        rl = int(record_len[b])
        if rl == 1:
            continue
        t_list.append(tmat[b, 0, 1:rl])
    theta = jnp.concatenate(t_list, axis=0)                   # (N_, 2, 3)

    # F.affine_grid with align_corners=False base coordinates
    xs = (2.0 * jnp.arange(W, dtype=jnp.float32) + 1.0) / W - 1.0
    ys = (2.0 * jnp.arange(H, dtype=jnp.float32) + 1.0) / H - 1.0
    X = (theta[:, 0, 0, None, None] * xs[None, None, :]
         + theta[:, 0, 1, None, None] * ys[None, :, None]
         + theta[:, 0, 2, None, None])
    Y = (theta[:, 1, 0, None, None] * xs[None, None, :]
         + theta[:, 1, 1, None, None] * ys[None, :, None]
         + theta[:, 1, 2, None, None])
    X_idx = jnp.trunc((X / 2.0 + 0.5) * W).astype(jnp.int32)
    Y_idx = jnp.trunc((Y / 2.0 + 0.5) * H).astype(jnp.int32)
    idx = Y_idx * W + X_idx
    valid = (X > -1) & (X < 1) & (Y > -1) & (Y < 1)
    return jnp.where(valid, idx, H * W)                       # (N_, H, W)


# ---------------------------------------------------------------------------
# Module wrapper (hyperparameters only; the torch module has no weights).
# ---------------------------------------------------------------------------
class PointPillarMashLossPallas:
    def __init__(self, args, det_tile=2048, ce_tile_p=512, ce_tile_c=512):
        self.cls_weight = float(args['cls_weight'])
        self.grid_weight = float(args['grid_weight'])
        self.reg_coe = float(args['reg'])
        self.H = int(args['H'])
        self.W = int(args['W'])
        self.downsample_rate = float(args['downsample_rate'])
        self.discrete_ratio = float(args['voxel_size'][0])
        self.det_tile = int(det_tile)
        self.ce_tile_p = int(ce_tile_p)
        self.ce_tile_c = int(ce_tile_c)

    def __call__(self, output_dict, target_dict):
        rm = output_dict['reg_preds']          # (B, 7A, Hf, Wf) NCHW
        psm = output_dict['cls_preds']         # (B, A,  Hf, Wf) NCHW
        targets = target_dict['targets']       # (B, Hf, Wf, 7A)
        labels = target_dict['pos_equal_one']  # (B, Hf, Wf, A)

        B, A, Hf, Wf = psm.shape
        HW = Hf * Wf

        # predictions: pure (free) reshapes of the native NCHW layout
        psm_r = psm.reshape(B, A, HW).astype(jnp.float32)          # (B, A, HW)
        rm_r4 = rm.reshape(B, A, 7, HW).astype(jnp.float32)        # (B, A, 7, HW)
        # labels / targets: single host transpose into the same layout
        lab_t = jnp.transpose(labels.reshape(B, HW, A), (0, 2, 1)).astype(jnp.float32)
        tg_r4 = jnp.transpose(targets.reshape(B, HW, A, 7), (0, 2, 3, 1)).astype(jnp.float32)

        cls_s, reg_s, pos_s = _det_partial_sums(
            psm_r, lab_t, rm_r4, tg_r4, self.det_tile)
        pos_norm = jnp.maximum(pos_s, 1.0)                         # (B,)
        conf_loss = jnp.sum(cls_s / pos_norm) / B * self.cls_weight
        reg_loss = jnp.sum(reg_s / pos_norm) / B * self.reg_coe
        total_loss = conf_loss + reg_loss

        corr_vol = output_dict.get('corr_vol', None)
        if corr_vol is not None:
            idx = _affine_grid_idx(
                target_dict['pairwise_t_matrix'], target_dict['record_len'],
                self.H, self.W, self.downsample_rate, self.discrete_ratio)

            N_, C = corr_vol.shape[0], corr_vol.shape[1]
            HWc = corr_vol.shape[2] * corr_vol.shape[3]
            corr_r = corr_vol.reshape(N_, C, HWc).astype(jnp.float32)
            gt_r = idx.reshape(N_, 1, HWc).astype(jnp.int32)
            M = N_ * HWc
            grid_loss = (_grid_ce_sum(corr_r, gt_r, self.ce_tile_p,
                                      self.ce_tile_c) / M) * self.grid_weight
            total_loss = total_loss + grid_loss

        # TODO(synk): loss_dict / .item() logging side-effects are omitted.
        return total_loss


# ---------------------------------------------------------------------------
# Pure-JAX references (torch math) for sanity checks.
# ---------------------------------------------------------------------------
def _ref_det(psm, pos_equal_one, rm, targets):
    B = psm.shape[0]
    cls_preds = jnp.transpose(psm, (0, 2, 3, 1)).reshape(B, -1)
    labels = pos_equal_one.reshape(B, -1).astype(jnp.float32)
    pos = (labels > 0).astype(jnp.float32)
    neg = (labels == 0).astype(jnp.float32)
    pos_norm = jnp.maximum(jnp.sum(pos, axis=1, keepdims=True), 1.0)
    cls_w = (neg + pos) / pos_norm
    reg_w = pos / pos_norm
    t = (labels.astype(jnp.int32) == 1).astype(jnp.float32)
    x = cls_preds
    p = jax.nn.sigmoid(x)
    alpha_w = t * ALPHA + (1 - t) * (1 - ALPHA)
    pt = t * (1 - p) + (1 - t) * p
    bce = jnp.maximum(x, 0.0) - x * t + jnp.log1p(jnp.exp(-jnp.abs(x)))
    cls_sum = jnp.sum(alpha_w * pt * pt * bce * cls_w)

    rm_f = jnp.transpose(rm, (0, 2, 3, 1)).reshape(B, -1, 7)
    tg_f = targets.reshape(B, -1, 7)
    rm6, tg6 = rm_f[..., 6:7], tg_f[..., 6:7]
    rm_s = jnp.concatenate([rm_f[..., :6], jnp.sin(rm6) * jnp.cos(tg6)], -1)
    tg_s = jnp.concatenate([tg_f[..., :6], jnp.cos(rm6) * jnp.sin(tg6)], -1)
    tg_s = jnp.where(jnp.isnan(tg_s), rm_s, tg_s)
    n = jnp.abs(rm_s - tg_s)
    sl1 = jnp.where(n < BETA, 0.5 * n * n / BETA, n - 0.5 * BETA)
    reg_sum = jnp.sum(sl1 * reg_w[..., None])
    return cls_sum / B, reg_sum / B


def _ref_grid(corr_vol, idx):
    C = corr_vol.shape[1]
    logits = jnp.transpose(corr_vol, (0, 2, 3, 1)).reshape(-1, C)
    g = idx.reshape(-1)
    lse = jax.scipy.special.logsumexp(logits, axis=-1)
    sel = jnp.take_along_axis(logits, g[:, None], axis=-1)[:, 0]
    return jnp.mean(lse - sel)


# ---------------------------------------------------------------------------
if __name__ == "__main__":
    def run_case(seed, H, W, det_tile, ce_tile_p, ce_tile_c):
        B, A, L = 2, 2, 3
        args = dict(cls_weight=1.0, grid_weight=0.5, reg=2.0, H=H, W=W,
                    downsample_rate=2, voxel_size=[0.4, 0.4, 4.0])
        keys = jax.random.split(jax.random.PRNGKey(seed), 6)

        psm = jax.random.normal(keys[0], (B, A, H, W), jnp.float32)
        rm = jax.random.normal(keys[1], (B, 7 * A, H, W), jnp.float32)
        pos_equal_one = (jax.random.uniform(keys[2], (B, H, W, A)) < 0.2
                         ).astype(jnp.float32)
        targets = jax.random.normal(keys[3], (B, H, W, 7 * A), jnp.float32)
        targets = targets.at[0, 0, 0, 0].set(jnp.nan)   # exercise NaN path

        record_len = np.array([2, 3], dtype=np.int64)
        pert = 0.1 * jax.random.normal(keys[4], (B, L, L, 4, 4), jnp.float32)
        pairwise_t_matrix = jnp.eye(4, dtype=jnp.float32)[None, None, None] + pert
        N_ = int(np.sum(record_len - 1))
        C = H * W + 1
        corr_vol = jax.random.normal(keys[5], (N_, C, H, W), jnp.float32)

        output_dict = {'reg_preds': rm, 'cls_preds': psm, 'corr_vol': corr_vol}
        target_dict = {'targets': targets, 'pos_equal_one': pos_equal_one,
                       'pairwise_t_matrix': pairwise_t_matrix,
                       'record_len': record_len}

        loss_fn = PointPillarMashLossPallas(
            args, det_tile=det_tile, ce_tile_p=ce_tile_p, ce_tile_c=ce_tile_c)
        total = loss_fn(output_dict, target_dict)
        jax.block_until_ready(total)

        # pure-JAX reference of the full forward
        conf_r, reg_r = _ref_det(psm, pos_equal_one, rm, targets)
        idx = _affine_grid_idx(pairwise_t_matrix, record_len, H, W,
                               args['downsample_rate'], args['voxel_size'][0])
        ref_total = (conf_r * args['cls_weight'] + reg_r * args['reg']
                     + _ref_grid(corr_vol, idx) * args['grid_weight'])

        np.testing.assert_allclose(np.asarray(total), np.asarray(ref_total),
                                   rtol=1e-3, atol=1e-4)
        assert np.isfinite(float(total))

    # Case 1: tiny shapes, single tile per axis.
    run_case(seed=0, H=8, W=8, det_tile=2048, ce_tile_p=512, ce_tile_c=512)
    # Case 2: larger spatial size; exercises multi-tile pixel streaming,
    # multi-chunk online-LSE and the masked partial class chunk.
    run_case(seed=1, H=32, W=32, det_tile=512, ce_tile_p=512, ce_tile_c=512)

    print("KERNEL_OK")
</pallas_src>

<mosaic_0001>
module attributes {stable_mosaic.version = 11 : i64} {
  func.func @_det_kernel(%arg0: i32, %arg1: i32, %arg2: memref<1x2x64xf32, #tpu.memory_space<vmem>>, %arg3: memref<1x2x64xf32, #tpu.memory_space<vmem>>, %arg4: memref<1x2x7x64xf32, #tpu.memory_space<vmem>>, %arg5: memref<1x2x7x64xf32, #tpu.memory_space<vmem>>, %arg6: memref<1x1x1xf32, #tpu.memory_space<vmem>>, %arg7: memref<1x1x1xf32, #tpu.memory_space<vmem>>, %arg8: memref<1x1x1xf32, #tpu.memory_space<vmem>>) attributes {dimension_semantics = [#tpu.dimension_semantics<parallel>, #tpu.dimension_semantics<arbitrary>], iteration_bounds = array<i64: 2, 1>, scalar_prefetch = 0 : i64, scratch_operands = 0 : i64, tpu.core_type = #tpu.core_type<tc>, window_params = [{transform_indices = @transform_0, window_bounds = array<i64: 1, 2, 64>}, {transform_indices = @transform_1, window_bounds = array<i64: 1, 2, 64>}, {transform_indices = @transform_2, window_bounds = array<i64: 1, 2, 7, 64>}, {transform_indices = @transform_3, window_bounds = array<i64: 1, 2, 7, 64>}, {transform_indices = @transform_4, window_bounds = array<i64: 1, 1, 1>}, {transform_indices = @transform_5, window_bounds = array<i64: 1, 1, 1>}, {transform_indices = @transform_6, window_bounds = array<i64: 1, 1, 1>}]} {
    %c0_i32 = arith.constant 0 : i32
    %0 = arith.cmpi eq, %arg1, %c0_i32 : i32
    %1 = arith.extui %0 : i1 to i32
    %c0_i32_0 = arith.constant 0 : i32
    %2 = arith.cmpi ne, %1, %c0_i32_0 : i32
    scf.if %2 {
      %cst_54 = arith.constant 0.000000e+00 : f32
      %127 = vector.broadcast %cst_54 : f32 to vector<1x1x1xf32>
      %c0_55 = arith.constant 0 : index
      %c0_56 = arith.constant 0 : index
      %c0_57 = arith.constant 0 : index
      %128 = vector.load %arg6[%c0_55, %c0_56, %c0_57] : memref<1x1x1xf32, #tpu.memory_space<vmem>>, vector<1x1x1xf32>
      tpu.vector_store %arg6[%c0_55, %c0_56, %c0_57], %127 {strides = array<i32>} : memref<1x1x1xf32, #tpu.memory_space<vmem>>, vector<1x1x1xf32>,
      %cst_58 = arith.constant 0.000000e+00 : f32
      %129 = vector.broadcast %cst_58 : f32 to vector<1x1x1xf32>
      %c0_59 = arith.constant 0 : index
      %c0_60 = arith.constant 0 : index
      %c0_61 = arith.constant 0 : index
      %130 = vector.load %arg7[%c0_59, %c0_60, %c0_61] : memref<1x1x1xf32, #tpu.memory_space<vmem>>, vector<1x1x1xf32>
      tpu.vector_store %arg7[%c0_59, %c0_60, %c0_61], %129 {strides = array<i32>} : memref<1x1x1xf32, #tpu.memory_space<vmem>>, vector<1x1x1xf32>,
      %cst_62 = arith.constant 0.000000e+00 : f32
      %131 = vector.broadcast %cst_62 : f32 to vector<1x1x1xf32>
      %c0_63 = arith.constant 0 : index
      %c0_64 = arith.constant 0 : index
      %c0_65 = arith.constant 0 : index
      %132 = vector.load %arg8[%c0_63, %c0_64, %c0_65] : memref<1x1x1xf32, #tpu.memory_space<vmem>>, vector<1x1x1xf32>
      tpu.vector_store %arg8[%c0_63, %c0_64, %c0_65], %131 {strides = array<i32>} : memref<1x1x1xf32, #tpu.memory_space<vmem>>, vector<1x1x1xf32>,
    } else {
    }
    %c0 = arith.constant 0 : index
    %c0_1 = arith.constant 0 : index
    %c0_2 = arith.constant 0 : index
    %3 = vector.load %arg3[%c0, %c0_1, %c0_2] : memref<1x2x64xf32, #tpu.memory_space<vmem>>, vector<1x2x64xf32>
    %c0_3 = arith.constant 0 : index
    %c0_4 = arith.constant 0 : index
    %c0_5 = arith.constant 0 : index
    %4 = vector.load %arg2[%c0_3, %c0_4, %c0_5] : memref<1x2x64xf32, #tpu.memory_space<vmem>>, vector<1x2x64xf32>
    %cst = arith.constant 0.000000e+00 : f32
    %5 = vector.broadcast %cst : f32 to vector<1x2x64xf32>
    %6 = arith.cmpf ogt, %3, %5 : vector<1x2x64xf32>
    %7 = arith.extui %6 : vector<1x2x64xi1> to vector<1x2x64xi32>
    %8 = arith.sitofp %7 : vector<1x2x64xi32> to vector<1x2x64xf32>
    %cst_6 = arith.constant 0.000000e+00 : f32
    %9 = vector.broadcast %cst_6 : f32 to vector<1x2x64xf32>
    %10 = arith.cmpf oeq, %3, %9 : vector<1x2x64xf32>
    %11 = arith.extui %10 : vector<1x2x64xi1> to vector<1x2x64xi32>
    %12 = arith.sitofp %11 : vector<1x2x64xi32> to vector<1x2x64xf32>
    %13 = arith.addf %12, %8 : vector<1x2x64xf32>
    %14 = arith.fptosi %3 : vector<1x2x64xf32> to vector<1x2x64xi32>
    %c1_i32 = arith.constant 1 : i32
    %15 = vector.broadcast %c1_i32 : i32 to vector<1x2x64xi32>
    %16 = arith.cmpi eq, %14, %15 : vector<1x2x64xi32>
    %17 = arith.extui %16 : vector<1x2x64xi1> to vector<1x2x64xi32>
    %18 = arith.sitofp %17 : vector<1x2x64xi32> to vector<1x2x64xf32>
    %19 = arith.negf %4 : vector<1x2x64xf32>
    %20 = math.exp %19 : vector<1x2x64xf32>
    %cst_7 = arith.constant 1.000000e+00 : f32
    %21 = vector.broadcast %cst_7 : f32 to vector<1x2x64xf32>
    %22 = arith.addf %21, %20 : vector<1x2x64xf32>
    %23 = arith.divf %21, %22 : vector<1x2x64xf32>
    %cst_8 = arith.constant 2.500000e-01 : f32
    %24 = vector.broadcast %cst_8 : f32 to vector<1x2x64xf32>
    %25 = arith.mulf %18, %24 : vector<1x2x64xf32>
    %cst_9 = arith.constant 1.000000e+00 : f32
    %26 = vector.broadcast %cst_9 : f32 to vector<1x2x64xf32>
    %27 = arith.subf %26, %18 : vector<1x2x64xf32>
    %cst_10 = arith.constant 7.500000e-01 : f32
    %28 = vector.broadcast %cst_10 : f32 to vector<1x2x64xf32>
    %29 = arith.mulf %27, %28 : vector<1x2x64xf32>
    %30 = arith.addf %25, %29 : vector<1x2x64xf32>
    %cst_11 = arith.constant 1.000000e+00 : f32
    %31 = vector.broadcast %cst_11 : f32 to vector<1x2x64xf32>
    %32 = arith.subf %31, %23 : vector<1x2x64xf32>
    %33 = arith.mulf %18, %32 : vector<1x2x64xf32>
    %cst_12 = arith.constant 1.000000e+00 : f32
    %34 = vector.broadcast %cst_12 : f32 to vector<1x2x64xf32>
    %35 = arith.subf %34, %18 : vector<1x2x64xf32>
    %36 = arith.mulf %35, %23 : vector<1x2x64xf32>
    %37 = arith.addf %33, %36 : vector<1x2x64xf32>
    %cst_13 = arith.constant 0.000000e+00 : f32
    %38 = vector.broadcast %cst_13 : f32 to vector<1x2x64xf32>
    %39 = arith.maximumf %4, %38 : vector<1x2x64xf32>
    %40 = arith.mulf %4, %18 : vector<1x2x64xf32>
    %41 = arith.subf %39, %40 : vector<1x2x64xf32>
    %42 = math.absf %4 : vector<1x2x64xf32>
    %cst_14 = arith.constant 0.000000e+00 : f32
    %43 = vector.broadcast %cst_14 : f32 to vector<1x2x64xf32>
    %44 = arith.subf %43, %42 : vector<1x2x64xf32>
    %45 = math.exp %44 : vector<1x2x64xf32>
    %cst_15 = arith.constant 1.000000e+00 : f32
    %46 = vector.broadcast %cst_15 : f32 to vector<1x2x64xf32>
    %47 = arith.addf %46, %45 : vector<1x2x64xf32>
    %48 = math.log %47 : vector<1x2x64xf32>
    %49 = arith.addf %41, %48 : vector<1x2x64xf32>
    %c0_16 = arith.constant 0 : index
    %c0_17 = arith.constant 0 : index
    %c0_18 = arith.constant 0 : index
    %50 = vector.load %arg6[%c0_16, %c0_17, %c0_18] : memref<1x1x1xf32, #tpu.memory_space<vmem>>, vector<1x1x1xf32>
    %51 = arith.mulf %30, %37 : vector<1x2x64xf32>
    %52 = arith.mulf %51, %37 : vector<1x2x64xf32>
    %53 = arith.mulf %52, %49 : vector<1x2x64xf32>
    %54 = arith.mulf %53, %13 : vector<1x2x64xf32>
    %55 = vector.shape_cast %54 : vector<1x2x64xf32> to vector<1x1x2x64xf32>
    %cst_19 = arith.constant dense<0.000000e+00> : vector<1xf32>
    %56 = vector.multi_reduction <add>, %55, %cst_19 [1, 2, 3] : vector<1x1x2x64xf32> to vector<1xf32>
    %57 = vector.shape_cast %56 : vector<1xf32> to vector<1x1x1x1xf32>
    %58 = vector.extract %57[0, 0, 0, 0] : f32 from vector<1x1x1x1xf32>
    %59 = vector.broadcast %58 : f32 to vector<1x1x1xf32>
    %60 = arith.addf %50, %59 : vector<1x1x1xf32>
    %c0_20 = arith.constant 0 : index
    %c0_21 = arith.constant 0 : index
    %c0_22 = arith.constant 0 : index
    %61 = vector.load %arg6[%c0_20, %c0_21, %c0_22] : memref<1x1x1xf32, #tpu.memory_space<vmem>>, vector<1x1x1xf32>
    tpu.vector_store %arg6[%c0_20, %c0_21, %c0_22], %60 {strides = array<i32>} : memref<1x1x1xf32, #tpu.memory_space<vmem>>, vector<1x1x1xf32>,
    %c0_23 = arith.constant 0 : index
    %c0_24 = arith.constant 0 : index
    %c0_25 = arith.constant 0 : index
    %62 = vector.load %arg8[%c0_23, %c0_24, %c0_25] : memref<1x1x1xf32, #tpu.memory_space<vmem>>, vector<1x1x1xf32>
    %63 = vector.shape_cast %8 : vector<1x2x64xf32> to vector<1x1x2x64xf32>
    %cst_26 = arith.constant dense<0.000000e+00> : vector<1xf32>
    %64 = vector.multi_reduction <add>, %63, %cst_26 [1, 2, 3] : vector<1x1x2x64xf32> to vector<1xf32>
    %65 = vector.shape_cast %64 : vector<1xf32> to vector<1x1x1x1xf32>
    %66 = vector.extract %65[0, 0, 0, 0] : f32 from vector<1x1x1x1xf32>
    %67 = vector.broadcast %66 : f32 to vector<1x1x1xf32>
    %68 = arith.addf %62, %67 : vector<1x1x1xf32>
    %c0_27 = arith.constant 0 : index
    %c0_28 = arith.constant 0 : index
    %c0_29 = arith.constant 0 : index
    %69 = vector.load %arg8[%c0_27, %c0_28, %c0_29] : memref<1x1x1xf32, #tpu.memory_space<vmem>>, vector<1x1x1xf32>
    tpu.vector_store %arg8[%c0_27, %c0_28, %c0_29], %68 {strides = array<i32>} : memref<1x1x1xf32, #tpu.memory_space<vmem>>, vector<1x1x1xf32>,
    %c0_30 = arith.constant 0 : index
    %c0_31 = arith.constant 0 : index
    %c0_32 = arith.constant 0 : index
    %c0_33 = arith.constant 0 : index
    %70 = vector.load %arg4[%c0_30, %c0_31, %c0_32, %c0_33] : memref<1x2x7x64xf32, #tpu.memory_space<vmem>>, vector<1x2x7x64xf32>
    %c0_34 = arith.constant 0 : index
    %c0_35 = arith.constant 0 : index
    %c0_36 = arith.constant 0 : index
    %c0_37 = arith.constant 0 : index
    %71 = vector.load %arg5[%c0_34, %c0_35, %c0_36, %c0_37] : memref<1x2x7x64xf32, #tpu.memory_space<vmem>>, vector<1x2x7x64xf32>
    %72 = vector.shape_cast %8 : vector<1x2x64xf32> to vector<1x2x1x64xf32>
    %73 = vector.extract_strided_slice %70 {offsets = [0, 0, 0, 0], sizes = [1, 2, 6, 64], strides = [1, 1, 1, 1]} : vector<1x2x7x64xf32> to vector<1x2x6x64xf32>
    %74 = vector.extract_strided_slice %71 {offsets = [0, 0, 0, 0], sizes = [1, 2, 6, 64], strides = [1, 1, 1, 1]} : vector<1x2x7x64xf32> to vector<1x2x6x64xf32>
    %75 = arith.cmpf one, %74, %74 : vector<1x2x6x64xf32>
    %76 = arith.select %75, %73, %74 : vector<1x2x6x64xi1>, vector<1x2x6x64xf32>
    %77 = arith.subf %73, %76 : vector<1x2x6x64xf32>
    %78 = math.absf %77 : vector<1x2x6x64xf32>
    %cst_38 = arith.constant 0.111111112 : f32
    %79 = vector.broadcast %cst_38 : f32 to vector<1x2x6x64xf32>
    %80 = arith.cmpf olt, %78, %79 : vector<1x2x6x64xf32>
    %cst_39 = arith.constant 5.000000e-01 : f32
    %81 = vector.broadcast %cst_39 : f32 to vector<1x2x6x64xf32>
    %82 = arith.mulf %81, %78 : vector<1x2x6x64xf32>
    %83 = arith.mulf %82, %78 : vector<1x2x6x64xf32>
    %cst_40 = arith.constant 0.111111112 : f32
    %84 = vector.broadcast %cst_40 : f32 to vector<1x2x6x64xf32>
    %85 = arith.divf %83, %84 : vector<1x2x6x64xf32>
    %cst_41 = arith.constant 0.055555556 : f32
    %86 = vector.broadcast %cst_41 : f32 to vector<1x2x6x64xf32>
    %87 = arith.subf %78, %86 : vector<1x2x6x64xf32>
    %88 = arith.select %80, %85, %87 : vector<1x2x6x64xi1>, vector<1x2x6x64xf32>
    %89 = vector.broadcast %72 : vector<1x2x1x64xf32> to vector<1x2x6x64xf32>
    %90 = arith.mulf %88, %89 : vector<1x2x6x64xf32>
    %91 = vector.shape_cast %90 : vector<1x2x6x64xf32> to vector<1x1x2x6x64xf32>
    %cst_42 = arith.constant dense<0.000000e+00> : vector<1xf32>
    %92 = vector.multi_reduction <add>, %91, %cst_42 [1, 2, 3, 4] : vector<1x1x2x6x64xf32> to vector<1xf32>
    %93 = vector.shape_cast %92 : vector<1xf32> to vector<1x1x1x1x1xf32>
    %94 = vector.extract %93[0, 0, 0, 0, 0] : f32 from vector<1x1x1x1x1xf32>
    %95 = vector.extract_strided_slice %70 {offsets = [0, 0, 6, 0], sizes = [1, 2, 1, 64], strides = [1, 1, 1, 1]} : vector<1x2x7x64xf32> to vector<1x2x1x64xf32>
    %96 = vector.extract_strided_slice %71 {offsets = [0, 0, 6, 0], sizes = [1, 2, 1, 64], strides = [1, 1, 1, 1]} : vector<1x2x7x64xf32> to vector<1x2x1x64xf32>
    %97 = math.sin %95 : vector<1x2x1x64xf32>
    %98 = math.cos %96 : vector<1x2x1x64xf32>
    %99 = arith.mulf %97, %98 : vector<1x2x1x64xf32>
    %100 = math.cos %95 : vector<1x2x1x64xf32>
    %101 = math.sin %96 : vector<1x2x1x64xf32>
    %102 = arith.mulf %100, %101 : vector<1x2x1x64xf32>
    %103 = arith.cmpf one, %102, %102 : vector<1x2x1x64xf32>
    %104 = arith.select %103, %99, %102 : vector<1x2x1x64xi1>, vector<1x2x1x64xf32>
    %105 = arith.subf %99, %104 : vector<1x2x1x64xf32>
    %106 = math.absf %105 : vector<1x2x1x64xf32>
    %cst_43 = arith.constant 0.111111112 : f32
    %107 = vector.broadcast %cst_43 : f32 to vector<1x2x1x64xf32>
    %108 = arith.cmpf olt, %106, %107 : vector<1x2x1x64xf32>
    %cst_44 = arith.constant 5.000000e-01 : f32
    %109 = vector.broadcast %cst_44 : f32 to vector<1x2x1x64xf32>
    %110 = arith.mulf %109, %106 : vector<1x2x1x64xf32>
    %111 = arith.mulf %110, %106 : vector<1x2x1x64xf32>
    %cst_45 = arith.constant 0.111111112 : f32
    %112 = vector.broadcast %cst_45 : f32 to vector<1x2x1x64xf32>
    %113 = arith.divf %111, %112 : vector<1x2x1x64xf32>
    %cst_46 = arith.constant 0.055555556 : f32
    %114 = vector.broadcast %cst_46 : f32 to vector<1x2x1x64xf32>
    %115 = arith.subf %106, %114 : vector<1x2x1x64xf32>
    %116 = arith.select %108, %113, %115 : vector<1x2x1x64xi1>, vector<1x2x1x64xf32>
    %117 = arith.mulf %116, %72 : vector<1x2x1x64xf32>
    %118 = vector.shape_cast %117 : vector<1x2x1x64xf32> to vector<1x1x2x1x64xf32>
    %cst_47 = arith.constant dense<0.000000e+00> : vector<1xf32>
    %119 = vector.multi_reduction <add>, %118, %cst_47 [1, 2, 3, 4] : vector<1x1x2x1x64xf32> to vector<1xf32>
    %120 = vector.shape_cast %119 : vector<1xf32> to vector<1x1x1x1x1xf32>
    %121 = vector.extract %120[0, 0, 0, 0, 0] : f32 from vector<1x1x1x1x1xf32>
    %122 = arith.addf %94, %121 : f32
    %c0_48 = arith.constant 0 : index
    %c0_49 = arith.constant 0 : index
    %c0_50 = arith.constant 0 : index
    %123 = vector.load %arg7[%c0_48, %c0_49, %c0_50] : memref<1x1x1xf32, #tpu.memory_space<vmem>>, vector<1x1x1xf32>
    %124 = vector.broadcast %122 : f32 to vector<1x1x1xf32>
    %125 = arith.addf %123, %124 : vector<1x1x1xf32>
    %c0_51 = arith.constant 0 : index
    %c0_52 = arith.constant 0 : index
    %c0_53 = arith.constant 0 : index
    %126 = vector.load %arg7[%c0_51, %c0_52, %c0_53] : memref<1x1x1xf32, #tpu.memory_space<vmem>>, vector<1x1x1xf32>
    tpu.vector_store %arg7[%c0_51, %c0_52, %c0_53], %125 {strides = array<i32>} : memref<1x1x1xf32, #tpu.memory_space<vmem>>, vector<1x1x1xf32>,
    return
  }
  func.func @transform_0(%arg0: i32, %arg1: i32) -> (i32, i32, i32) {
    %c0_i32 = arith.constant 0 : i32
    %c0_i32_0 = arith.constant 0 : i32
    return %arg0, %c0_i32, %arg1 : i32, i32, i32
  }
  func.func @transform_1(%arg0: i32, %arg1: i32) -> (i32, i32, i32) {
    %c0_i32 = arith.constant 0 : i32
    %c0_i32_0 = arith.constant 0 : i32
    return %arg0, %c0_i32, %arg1 : i32, i32, i32
  }
  func.func @transform_2(%arg0: i32, %arg1: i32) -> (i32, i32, i32, i32) {
    %c0_i32 = arith.constant 0 : i32
    %c0_i32_0 = arith.constant 0 : i32
    %c0_i32_1 = arith.constant 0 : i32
    return %arg0, %c0_i32, %c0_i32_0, %arg1 : i32, i32, i32, i32
  }
  func.func @transform_3(%arg0: i32, %arg1: i32) -> (i32, i32, i32, i32) {
    %c0_i32 = arith.constant 0 : i32
    %c0_i32_0 = arith.constant 0 : i32
    %c0_i32_1 = arith.constant 0 : i32
    return %arg0, %c0_i32, %c0_i32_0, %arg1 : i32, i32, i32, i32
  }
  func.func @transform_4(%arg0: i32, %arg1: i32) -> (i32, i32, i32) {
    %c0_i32 = arith.constant 0 : i32
    %c0_i32_0 = arith.constant 0 : i32
    %c0_i32_1 = arith.constant 0 : i32
    return %arg0, %c0_i32, %c0_i32_0 : i32, i32, i32
  }
  func.func @transform_5(%arg0: i32, %arg1: i32) -> (i32, i32, i32) {
    %c0_i32 = arith.constant 0 : i32
    %c0_i32_0 = arith.constant 0 : i32
    %c0_i32_1 = arith.constant 0 : i32
    return %arg0, %c0_i32, %c0_i32_0 : i32, i32, i32
  }
  func.func @transform_6(%arg0: i32, %arg1: i32) -> (i32, i32, i32) {
    %c0_i32 = arith.constant 0 : i32
    %c0_i32_0 = arith.constant 0 : i32
    %c0_i32_1 = arith.constant 0 : i32
    return %arg0, %c0_i32, %c0_i32_0 : i32, i32, i32
  }
}

</mosaic_0001>

<bundles_post_ra>
// kernel: tpu_custom_call.1
= control target key start
LH: loop header
LB: loop body
LE: loop exit
PB: predicated region body
PF: predicated region fallthrough
CT: control target
= control target key end

     0   :  { %s2140_s21 = smov 0   ;;  %s2142_s22 = smov 0   ;;  %s2793_s0 = inlined_call_operand.vmem [shape: f32[2,2,64], index: 0, kind: input, shape index: {}]   ;;  %s2794_s1 = inlined_call_operand.vmem [shape: f32[2,2,64], index: 1, kind: input, shape index: {}]   ;;  %s2795_s2 = inlined_call_operand.vmem [shape: f32[2,2,7,64], index: 2, kind: input, shape index: {}]   ;;  %s2796_s3 = inlined_call_operand.vmem [shape: f32[2,2,7,64], index: 3, kind: input, shape index: {}]   ;;  %s2797_s4 = inlined_call_operand.vmem [shape: f32[2,1,1], index: 4, kind: output, shape index: {0}]   ;;  %s2798_s5 = inlined_call_operand.vmem [shape: f32[2,1,1], index: 5, kind: output, shape index: {1}]   ;;  %s2799_s6 = inlined_call_operand.vmem [shape: f32[2,1,1], index: 6, kind: output, shape index: {2}]  }
   0x1   :  { %s2144_s23 = smov 0  }
   0x2 LB: > { %s29_s24 = sadd.s32 1, %s2090_s22  ;;  %p1969_p0 = scmp.ge.s32.totalorder %s2094_s23, 1  ;;  %s2094_s23 = sphi %s2144_s23, %s17_s23   ;;  %s2090_s22 = sphi %s2142_s22, %s2811_s22   ;;  %s2086_s21 = sphi %s2140_s21, %s2810_s21  }
   0x3   : > { %p31_p1 = scmp.ge.s32.totalorder %s29_s24, 2  ;;  %p277_p2 = scmp.lt.s32.totalorder %s2094_s23, 3 }
   0x5   : > { %s2813_s24 = smov (%p31_p1, %s29_s24), 0  ;;  %p278_p3 = pnand %p1969_p0, %p277_p2 }
   0x6   : > { %p336_p4 = scmp.lt.s32.totalorder (!%p278_p3), %s2086_s21, 1 }
   0x7   : > { %281 = sbr.rel (%p278_p3) target bundleno = 418 (0x1a2), region = 36 }
   0xc   : > { %s2815_s21 = smov (!%p336_p4, %s2086_s21), 1  ;;  %v2096_v18 = vmov 0.0   ;;  %v2097_v43 = vmov 0.11111111   ;;  %vm507_vm14 = vcmask 521216  }
   0xd   : > { %s1970_s25 = sshll.u32 %s2815_s21, 1  ;;  %s2010_s26 = sshll.u32 %s2815_s21, 4 }
   0xe   : > { %s342_s29 = scalar_lea.vmem %s2793_s0, %s1970_s25  ;;  %s349_s8 = scalar_lea.vmem %s2794_s1, %s1970_s25 }
   0xf   : > { %v383_v0 = vld [vmem:[%s349_s8] sm:$0x3]  ;;  %s2173_s11 = scalar_lea.vmem %s2795_s2, %s2010_s26  ;;  %s2186_s14 = scalar_lea.vmem %s2796_s3, %s2010_s26 }
  0x10   : > { %v2168_v1 = vld [vmem:[%s342_s29] sm:$0x3]  ;;  %vm2012_vm0 = vcmp.lt.s32.totalorder %v383_v0, 0  ;;  %v2013_v2 = vceil.f32 %v383_v0  ;;  %v2014_v4 = vfloor.f32 %v383_v0  ;;  %v2180_v6 = vld [vmem:[%s2173_s11 + $0x8] sm:$0x7f]  ;;  %vm385_vm1 = vcmp.gt.f32.partialorder %v383_v0, 0.0  ;;  %s368_s17 = scalar_lea.vmem %s2797_s4, %s2815_s21  ;;  %s374_s20 = scalar_lea.vmem %s2799_s6, %s2815_s21 }
  0x11   : > { %v2176_v3 = vld [vmem:[%s2173_s11] sm:$0x7f]  ;;  %v1979_v5 = vmul.f32 -1.442695, %v2168_v1  ;;  %v426_v7 = vand.u32 2147483647, %v2168_v1  ;;  %s371_s27 = scalar_lea.vmem %s2798_s5, %s2815_s21 }
  0x12   : > { %v523_v8 = vand.u32 2139095040, %v2176_v3  ;;  %v2015_v9 = vsel %vm2012_vm0, %v2013_v2, %v2014_v4  ;;  %v678_v10 = vand.u32 2139095040, %v2180_v6  ;;  %vm388_vm2 = vcmp.eq.f32.partialorder %v383_v0, 0.0  ;;  %v2191_v14 = vld [vmem:[%s2186_s14] sm:$0x7f] }
  0x13   : > { %2058 = vpow2.f32 %v1979_v5  ;;  %v2016_v11 = vcvt.f32.s32 %v2015_v9  ;;  %v427_v12 = vsub.f32 0.0, %v426_v7  ;;  %v2194_v19 = vsel %vm385_vm1, 1.0, %v2096_v18  ;;  %v2207_v30 = vld [vmem:[%s2186_s14 + $0x8] sm:$0x7f] }
  0x14   : > { %v524_v13 = vshrl.u32 %v523_v8, 23  ;;  %v679_v17 = vshrl.u32 %v678_v10, 23  ;;  %v1977_v20 = vsel %vm388_vm2, 1.0, %v2096_v18  ;;  %v833_v23 = vand.u32 2139095040, %v2191_v14 }
  0x15   : > { %vm393_vm3 = vcmp.eq.s32.totalorder %v2016_v11, 1  ;;  %v428_v15 = vmul.f32 1.442695, %v427_v12  ;;  %v2202_v27 = vadd.f32 %v1977_v20, %v2194_v19  ;;  %v423_v29 = vmax.f32 %v2168_v1, 0.0 }
  0x16   : > { %v1982_v16 = vadd.s32 4294967169, %v524_v13  ;;  %v2198_v22 = vsel %vm393_vm3, 1.0, %v2096_v18  ;;  %v1985_v26 = vadd.s32 4294967169, %v679_v17  ;;  %v520_v31 = vand.u32 2147483647, %v2176_v3 }
  0x17   : > { %2060 = vpow2.f32 %v428_v15  ;;  %v416_v28 = vsub.f32 1.0, %v2198_v22  ;;  %v424_v32 = vmul.f32 %v2198_v22, %v2168_v1  ;;  %vm474_vm4 = vcmp.ne.f32.partialorder %v2191_v14, %v2191_v14 }
  0x18   : > { %v530_v25 = vadd.s32 1, %v1982_v16  ;;  %vm475_vm5 = vcmp.ne.f32.partialorder %v2207_v30, %v2207_v30  ;;  %v834_v33 = vshrl.u32 %v833_v23, 23  ;;  %v476_v35 = vsel %vm474_vm4, %v2176_v3, %v2191_v14 }
  0x19   : > { %v2059_v21 = vpop.eup %2058  ;;  %v477_v36 = vsel %vm475_vm5, %v2180_v6, %v2207_v30  ;;  %v685_v37 = vadd.s32 1, %v1985_v26  ;;  %v478_v39 = vsub.f32 %v2176_v3, %v476_v35  ;;  %v415_v41 = vmul.f32 0.25, %v2198_v22 }
  0x1a   : > { %v399_v24 = vadd.f32 1.0, %v2059_v21  ;;  %vm531_vm6 = vcmp.gt.s32.totalorder %v530_v25, 0  ;;  %v479_v40 = vsub.f32 %v2180_v6, %v477_v36  ;;  %v417_v42 = vmul.f32 0.75, %v416_v28 }
  0x1b   : > { %v2227_v44 = vand.u32 8388607, %v520_v31  ;;  %v532_v47 = vsel %vm531_vm6, %v530_v25, 0  ;;  %v473_v49 = vrot.slane %v2194_v19, 1  ;;  %v2230_v50 = vand.u32 2147483647, %v478_v39 }
  0x1c   : > { %2062 = vrcp.f32 %v399_v24  ;;  %v409_v45 = vand.u32 2147483647, %v399_v24  ;;  %v411_v46 = vand.u32 2147483648, %v399_v24  ;;  %v2232_v51 = vadd.s32 4294967169, %v834_v33 }
  0x1d   : > { %v2061_v34 = vpop.eup %2060  ;;  %2064 = vrcp.f32 %v2097_v43  ;;  %v425_v53 = vsub.f32 %v423_v29, %v424_v32  ;;  %v2234_v54 = vand.u32 2147483647, %v479_v40  ;;  %vm686_vm7 = vcmp.gt.s32.totalorder %v685_v37, 0 }
  0x1e   : > { %v430_v38 = vadd.f32 1.0, %v2061_v34  ;;  %vm405_vm8 = vweird.f32 %v399_v24  ;;  %v2236_v55 = vadd.f32 %v417_v42, %v415_v41  ;;  %v2238_v56 = vand.u32 31, %v532_v47 }
  0x1f   : > { %v528_v57 = vor.u32 8388608, %v2227_v44  ;;  %vm2241_vm10 = vcmp.eq.f32.partialorder %v409_v45, 8.507059e+37  ;;  %v412_v60 = vor.u32 1.1754944e-38, %v411_v46  ;;  %v484_v62 = vmul.f32 0.5, %v2230_v50 }
  0x20   : > { %2066 = vlog2.f32 %v430_v38  ;;  %v501_v63 = vperm.slane %v2194_v19, 0  ;;  %v2247_v0 = vperm.slane %v473_v49, 0  ;;  %v687_v1 = vsel %vm686_vm7, %v685_v37, 0 }
  0x21   : > { %vm482_vm11 = vcmp.lt.f32.partialorder %v2230_v50, 0.11111111  ;;  %v485_v5 = vmul.f32 0.5, %v2234_v54  ;;  %vm483_vm13 = vcmp.lt.f32.partialorder %v2234_v54, 0.11111111  ;;  %v2257_v10 = vshrl.u32 %v532_v47, 5 }
  0x22   : > { %v2063_v48 = vpop.eup %2062  ;;  %v535_v11 = vsub.s32 32, %v2238_v56  ;;  %v1980_v15 = vadd.f32 -0.055555556, %v2230_v50  ;;  %v1981_v16 = vadd.f32 -0.055555556, %v2234_v54  ;;  %v486_v17 = vmul.f32 %v484_v62, %v2230_v50 }
  0x23   : > { %v401_v52 = vmul.f32 %v2063_v48, %v399_v24  ;;  %vm406_vm9 = vweird.f32 %v2063_v48  ;;  %v2065_v61 = vpop.eup %2064  ;;  %v2263_v20 = vshrl.u32 %v687_v1, 5  ;;  %v2265_v21 = vand.u32 31, %v687_v1 }
  0x24   : > { %v489_v7 = vmul.f32 0.11111111, %v2065_v61  ;;  %vm2252_vm12 = vmor %vm405_vm8, %vm406_vm9  ;;  %v2098_v23 = vmov 683565275   ;;  %v487_v26 = vmul.f32 %v485_v5, %v2234_v54  ;;  %vm493_vm15 = vweird.f32 %v2065_v61 }
  0x25   : > { %v402_v58 = vsub.f32 1.0, %v401_v52  ;;  %v537_v24 = vshll.u32 %v2098_v23, %v2238_v56  ;;  %v2099_v34 = vmov 2475754826   ;;  %v536_v40 = vshrl.u32 %v2098_v23, %v535_v11 }
  0x26   : > { %v2067_v2 = vpop.eup %2066  ;;  %v490_v13 = vsub.f32 1.0, %v489_v7  ;;  %v538_v35 = vshrl.u32 %v2099_v34, %v535_v11  ;;  %v540_v39 = vshll.u32 %v2099_v34, %v2238_v56  ;;  %v2100_v42 = vmov 2102212464  }
  0x27   : > { %v403_v4 = vmul.f32 %v2063_v48, %v402_v58  ;;  %v432_v9 = vmul.f32 0.6931472, %v2067_v2  ;;  %v544_v43 = vshrl.u32 %v2100_v42, %v535_v11  ;;  %v2101_v47 = vmov 2131351028  }
  0x28   : > { %v491_v29 = vmul.f32 %v2065_v61, %v490_v13  ;;  %v539_v41 = vor.u32 %v538_v35, %v537_v24  ;;  %vm439_vm0 = vcmask 517120   ;;  %vm552_vm1 = vcmp.lt.s32.totalorder %v2257_v10, 1 }
  0x29   : > { %v404_v12 = vadd.f32 %v2063_v48, %v403_v4  ;;  %v433_v33 = vadd.f32 %v432_v9, %v425_v53  ;;  %v546_v53 = vshll.u32 %v2100_v42, %v2238_v56  ;;  %v2103_v9 = vmov 1326507024  }
  0x2a   : > { %v492_v38 = vadd.f32 %v2065_v61, %v491_v29  ;;  %vm553_vm2 = vcmp.lt.s32.totalorder %v2257_v10, 2  ;;  %vm554_vm3 = vcmp.lt.s32.totalorder %v2257_v10, 3  ;;  %vm555_vm4 = vcmp.lt.s32.totalorder %v2257_v10, 4 }
  0x2b   : > { %v408_v25 = vsel %vm2252_vm12, %v2063_v48, %v404_v12  ;;  %v541_v48 = vshrl.u32 %v2101_v47, %v535_v11  ;;  %v550_v12 = vshrl.u32 %v2103_v9, %v535_v11  ;;  %v455_v44 = vsel %vm439_vm0, %v2194_v19, 0.0 }
  0x2c   : > { %v413_v32 = vsel %vm2241_vm10, %v412_v60, %v408_v25  ;;  %v2282_v46 = vsel %vm493_vm15, %v2065_v61, %v492_v38  ;;  %v2330_v38 = vshll.u32 %v528_v57, 8  ;;  %vm707_vm9 = vcmp.lt.s32.totalorder %v2263_v20, 1 }
  0x2d   : > { %v419_v36 = vsub.f32 1.0, %v413_v32  ;;  %v421_v37 = vmul.f32 %v416_v28, %v413_v32  ;;  %v543_v28 = vshll.u32 %v2101_v47, %v2238_v56  ;;  %v495_v49 = vmul.f32 %v2282_v46, %v486_v17 }
  0x2e   : > { %v496_v52 = vmul.f32 %v2282_v46, %v487_v26  ;;  %v542_v59 = vor.u32 %v541_v48, %v540_v39  ;;  %v2333_v39 = vsub.s32 32, %v2265_v21  ;;  %v570_v48 = vshrl.u32 %v2330_v38, 16 }
  0x2f   : > { %v420_v45 = vmul.f32 %v2198_v22, %v419_v36  ;;  %v545_v60 = vor.u32 %v544_v43, %v543_v28  ;;  %v2102_v22 = vmov 920167782   ;;  %v499_v62 = vsel %vm482_vm11, %v495_v49, %v1980_v15 }
  0x30   : > { %v547_v61 = vshrl.u32 %v2102_v22, %v535_v11  ;;  %v500_v1 = vsel %vm483_vm13, %v496_v52, %v1981_v16  ;;  %v549_v2 = vshll.u32 %v2102_v22, %v2238_v56  ;;  %v505_v5 = vmul.f32 %v501_v63, %v499_v62 }
  0x31   : > { %v422_v58 = vadd.f32 %v421_v37, %v420_v45  ;;  %v506_v7 = vmul.f32 %v2247_v0, %v500_v1  ;;  %v556_v15 = vsel %vm552_vm1, %v536_v40, %v539_v41  ;;  %v557_v16 = vsel %vm555_vm4, %v545_v60, 2102212464 }
  0x32   : > { %v548_v8 = vor.u32 %v547_v61, %v546_v53  ;;  %v508_v54 = vsel %vm507_vm14, %v505_v5, 0.0  ;;  %v551_v13 = vor.u32 %v550_v12, %v549_v2  ;;  %v558_v17 = vsel %vm554_vm3, %v542_v59, %v557_v16 }
  0x33   : > { %v435_v4 = vmul.f32 %v422_v58, %v2236_v55  ;;  %v509_v55 = vsel %vm507_vm14, %v506_v7, 0.0  ;;  %v560_v24 = vsel %vm552_vm1, %v539_v41, %v542_v59  ;;  %v2317_v26 = vsel %vm553_vm2, %v556_v15, %v558_v17 }
  0x34   : > { %v510_v56 = vadd.f32 %v509_v55, %v508_v54  ;;  %v561_v25 = vsel %vm555_vm4, %v548_v8, 920167782  ;;  %v564_v32 = vsel %vm552_vm1, %v542_v59, %v545_v60  ;;  %v565_v35 = vsel %vm555_vm4, %v551_v13, 1326507024 }
  0x35   : > { %v436_v50 = vmul.f32 %v435_v4, %v422_v58  ;;  %v562_v29 = vsel %vm554_vm3, %v545_v60, %v561_v25  ;;  %v566_v37 = vsel %vm554_vm3, %v548_v8, %v565_v35  ;;  %v569_v45 = vand.u32 65535, %v2330_v38 }
  0x36   : > { %511 = vadd.xlane.f32.xlu1 %v510_v56  ;;  %v563_v36 = vsel %vm553_vm2, %v560_v24, %v562_v29  ;;  %v567_v40 = vsel %vm553_vm2, %v564_v32, %v566_v37  ;;  %v613_v49 = vmul.u32 %v2330_v38, %v2317_v26  ;;  %v675_v58 = vand.u32 2147483647, %v2180_v6 }
  0x37   : > { %v437_v11 = vmul.f32 %v436_v50, %v433_v33  ;;  %v593_v41 = vand.u32 65535, %v563_v36  ;;  %v594_v43 = vshrl.u32 %v563_v36, 16  ;;  %v571_v28 = vand.u32 65535, %v567_v40 }
  0x38   : > { %v572_v57 = vshrl.u32 %v567_v40, 16  ;;  %v692_v56 = vshll.u32 %v2098_v23, %v2265_v21  ;;  %v2104_v15 = vmov 0   ;;  %v682_v25 = vand.u32 8388607, %v675_v58 }
  0x39   : > { %v438_v33 = vmul.f32 %v437_v11, %v2202_v27  ;;  %v575_v52 = vmul.u32 %v571_v28, %v570_v48  ;;  %v595_v10 = vmul.u32 %v593_v41, %v569_v45  ;;  %v596_v53 = vmul.u32 %v594_v43, %v569_v45 }
  0x3a   : > { %v573_v59 = vmul.u32 %v571_v28, %v569_v45  ;;  %v574_v60 = vmul.u32 %v572_v57, %v569_v45  ;;  %v576_v61 = vmul.u32 %v572_v57, %v570_v48  ;;  %v597_v62 = vmul.u32 %v593_v41, %v570_v48 }
  0x3b   : > { %v440_v27 = vsel %vm439_vm0, %v438_v33, 0.0  ;;  %v579_v1 = vshll.u32 %v575_v52, 16  ;;  %v580_v2 = vshrl.u32 %v575_v52, 16  ;;  %v598_v4 = vmul.u32 %v594_v43, %v570_v48 }
  0x3c   : > { %441 = vadd.xlane.f32.xlu0 %v440_v27  ;;  %v599_v5 = vshll.u32 %v596_v53, 16  ;;  %v577_v7 = vshll.u32 %v574_v60, 16  ;;  %v578_v8 = vshrl.u32 %v574_v60, 16  ;;  %v600_v12 = vshrl.u32 %v596_v53, 16 }
  0x3d   : > { %v601_v50 = vshll.u32 %v597_v62, 16  ;;  %v602_v54 = vshrl.u32 %v597_v62, 16  ;;  %v693_v11 = vshrl.u32 %v2099_v34, %v2333_v39  ;;  %v695_v40 = vshll.u32 %v2099_v34, %v2265_v21 }
  0x3e   : > { %vm603_vm5 = vc.u32 %v595_v10, %v599_v5  ;;  %v605_v55 = vadd.s32 %v599_v5, %v595_v10  ;;  %vm581_vm6 = vc.u32 %v573_v59, %v577_v7  ;;  %v583_v13 = vadd.s32 %v577_v7, %v573_v59 }
  0x3f   : > { %v604_v16 = vsel %vm603_vm5, 1, %v2104_v15  ;;  %v582_v17 = vsel %vm581_vm6, 1, %v2104_v15  ;;  %v2357_v37 = vor.u32 %v693_v11, %v692_v56  ;;  %v696_v43 = vshrl.u32 %v2101_v47, %v2333_v39 }
  0x40   : > { %v606_v24 = vadd.s32 %v604_v16, %v598_v4  ;;  %vm607_vm7 = vc.u32 %v605_v55, %v601_v50  ;;  %v584_v29 = vadd.s32 %v582_v17, %v576_v61  ;;  %vm585_vm8 = vc.u32 %v583_v13, %v579_v1 }
  0x41   : > { %v608_v32 = vsel %vm607_vm7, 1, %v2104_v15  ;;  %v2354_v35 = vadd.s32 %v605_v55, %v601_v50  ;;  %v586_v33 = vsel %vm585_vm8, 1, %v2104_v15  ;;  %v698_v27 = vshll.u32 %v2101_v47, %v2265_v21 }
  0x42   : > { %v610_v36 = vadd.s32 %v608_v32, %v606_v24  ;;  %v588_v41 = vadd.s32 %v586_v33, %v584_v29  ;;  %v699_v45 = vshrl.u32 %v2100_v42, %v2333_v39  ;;  %v701_v28 = vshll.u32 %v2100_v42, %v2265_v21 }
  0x43   : > { %v704_v57 = vshll.u32 %v2102_v22, %v2265_v21  ;;  %v683_v10 = vor.u32 8388608, %v682_v25  ;;  %v2373_v53 = vor.u32 %v696_v43, %v695_v40  ;;  %v705_v59 = vshrl.u32 %v2103_v9, %v2333_v39 }
  0x44   : > { %456 = vadd.xlane.f32.xlu0 %v455_v44  ;;  %v611_v48 = vadd.s32 %v610_v36, %v600_v12  ;;  %v702_v44 = vshrl.u32 %v2102_v22, %v2333_v39  ;;  %v589_v52 = vadd.s32 %v588_v41, %v578_v8  ;;  %v700_v61 = vor.u32 %v699_v45, %v698_v27 }
  0x45   : > { %v706_v4 = vor.u32 %v705_v59, %v704_v57  ;;  %vm709_vm10 = vcmp.lt.s32.totalorder %v2263_v20, 3  ;;  %vm710_vm11 = vcmp.lt.s32.totalorder %v2263_v20, 4  ;;  %vm708_vm12 = vcmp.lt.s32.totalorder %v2263_v20, 2 }
  0x46   : > { %v612_v60 = vadd.s32 %v611_v48, %v602_v54  ;;  %v703_v62 = vor.u32 %v702_v44, %v701_v28  ;;  %v2378_v1 = vadd.s32 %v589_v52, %v580_v2  ;;  %v715_v5 = vsel %vm707_vm9, %v2357_v37, %v2373_v53 }
  0x47   : > { %v840_v7 = vadd.s32 1, %v2232_v51  ;;  %v719_v50 = vsel %vm707_vm9, %v2373_v53, %v700_v61  ;;  %v720_v56 = vsel %vm710_vm11, %v706_v4, 1326507024  ;;  %v2404_v13 = vshll.u32 %v683_v10, 8 }
  0x48   : > { %v616_v21 = vadd.s32 1, %v612_v60  ;;  %vm615_vm13 = vc.u32 %v2378_v1, %v2354_v35  ;;  %v716_v2 = vsel %vm710_vm11, %v703_v62, 920167782  ;;  %v721_v51 = vsel %vm709_vm10, %v703_v62, %v720_v56 }
  0x49   : > { %v717_v12 = vsel %vm709_vm10, %v700_v61, %v716_v2  ;;  %v722_v24 = vsel %vm708_vm12, %v719_v50, %v721_v51  ;;  %v724_v26 = vand.u32 65535, %v2404_v13  ;;  %v725_v38 = vshrl.u32 %v2404_v13, 16 }
  0x4a   : > { %v617_v8 = vsel %vm615_vm13, %v616_v21, %v612_v60  ;;  %v718_v55 = vsel %vm708_vm12, %v715_v5, %v717_v12  ;;  %v727_v25 = vshrl.u32 %v722_v24, 16  ;;  %vm841_vm14 = vcmp.gt.s32.totalorder %v840_v7, 0 }
  0x4b   : > { %v618_v54 = vadd.s32 %v617_v8, %v613_v49  ;;  %v748_v16 = vand.u32 65535, %v718_v55  ;;  %v749_v11 = vshrl.u32 %v718_v55, 16  ;;  %v726_v49 = vand.u32 65535, %v722_v24 }
  0x4c   : > { %v729_v36 = vmul.u32 %v727_v25, %v724_v26  ;;  %v731_v27 = vmul.u32 %v727_v25, %v725_v38  ;;  %v842_v44 = vsel %vm841_vm14, %v840_v7, 0  ;;  %v691_v59 = vshrl.u32 %v2098_v23, %v2333_v39 }
  0x4d   : > { %v619_v17 = vadd.s32 536870912, %v618_v54  ;;  %v751_v29 = vmul.u32 %v749_v11, %v724_v26  ;;  %v728_v33 = vmul.u32 %v726_v49, %v724_v26  ;;  %v730_v40 = vmul.u32 %v726_v49, %v725_v38 }
  0x4e   : > { %v750_v41 = vmul.u32 %v748_v16, %v724_v26  ;;  %v752_v43 = vmul.u32 %v748_v16, %v725_v38  ;;  %v732_v45 = vshll.u32 %v729_v36, 16  ;;  %v753_v10 = vmul.u32 %v749_v11, %v725_v38 }
  0x4f   : > { %v2412_v32 = vshrl.u32 %v619_v17, 30  ;;  %v734_v48 = vshll.u32 %v730_v40, 16  ;;  %v754_v28 = vshll.u32 %v751_v29, 16  ;;  %v712_v60 = vsel %vm710_vm11, %v700_v61, 2102212464 }
  0x50   : > { %vm736_vm15 = vc.u32 %v728_v33, %v732_v45  ;;  %v738_v52 = vadd.s32 %v732_v45, %v728_v33  ;;  %v756_v4 = vshll.u32 %v752_v43, 16  ;;  %v733_v21 = vshrl.u32 %v729_v36, 16 }
  0x51   : > { %v621_v57 = vshll.u32 %v2412_v32, 30  ;;  %v737_v62 = vsel %vm736_vm15, 1, %v2104_v15  ;;  %vm758_vm1 = vc.u32 %v750_v41, %v754_v28  ;;  %v844_v2 = vand.u32 31, %v842_v44 }
  0x52   : > { %v739_v5 = vadd.s32 %v737_v62, %v731_v27  ;;  %vm740_vm0 = vc.u32 %v738_v52, %v734_v48  ;;  %v759_v8 = vsel %vm758_vm1, 1, %v2104_v15  ;;  %v760_v12 = vadd.s32 %v754_v28, %v750_v41 }
  0x53   : > { %v741_v7 = vsel %vm740_vm0, 1, %v2104_v15  ;;  %v2422_v50 = vsub.s32 %v618_v54, %v621_v57  ;;  %v735_v55 = vshrl.u32 %v730_v40, 16  ;;  %v761_v56 = vadd.s32 %v759_v8, %v753_v10 }
  0x54   : > { %v743_v39 = vadd.s32 %v741_v7, %v739_v5  ;;  %v711_v61 = vsel %vm707_vm9, %v691_v59, %v2357_v37  ;;  %v713_v51 = vsel %vm709_vm10, %v2373_v53, %v712_v60  ;;  %v755_v16 = vshrl.u32 %v751_v29, 16 }
  0x55   : > { %vm762_vm2 = vc.u32 %v760_v12, %v756_v4  ;;  %v2431_v24 = vsub.s32 32, %v844_v2  ;;  %v757_v54 = vshrl.u32 %v752_v43, 16  ;;  %v830_v38 = vand.u32 2147483647, %v2191_v14 }
  0x56   : > { %v744_v11 = vadd.s32 %v743_v39, %v733_v21  ;;  %v763_v17 = vsel %vm762_vm2, 1, %v2104_v15  ;;  %v624_v49 = vsub.s32 0, %v2422_v50  ;;  %v714_v37 = vsel %vm708_vm12, %v711_v61, %v713_v51 }
  0x57   : > { %v765_v26 = vadd.s32 %v763_v17, %v761_v56  ;;  %v2439_v33 = vadd.s32 %v760_v12, %v756_v4  ;;  %vm623_vm3 = vcmp.lt.s32.totalorder %v2422_v50, 0  ;;  %v2442_v29 = vshrl.u32 %v842_v44, 5 }
  0x58   : > { %v2437_v25 = vadd.s32 %v744_v11, %v735_v55  ;;  %v768_v40 = vmul.u32 %v2404_v13, %v714_v37  ;;  %v837_v41 = vand.u32 8388607, %v830_v38  ;;  %v625_v43 = vsel %vm623_vm3, %v624_v49, %v2422_v50 }
  0x59   : > { %v766_v53 = vadd.s32 %v765_v26, %v755_v16  ;;  %v850_v20 = vshll.u32 %v2099_v34, %v844_v2  ;;  %v851_v27 = vshrl.u32 %v2101_v47, %v2431_v24  ;;  %v853_v48 = vshll.u32 %v2101_v47, %v844_v2 }
  0x5a   : > { %vm770_vm4 = vc.u32 %v2437_v25, %v2439_v33  ;;  %v854_v28 = vshrl.u32 %v2100_v42, %v2431_v24  ;;  %v856_v13 = vshll.u32 %v2100_v42, %v844_v2  ;;  %v847_v44 = vshll.u32 %v2098_v23, %v844_v2 }
  0x5b   : > { %v767_v36 = vadd.s32 %v766_v53, %v757_v54  ;;  %v848_v57 = vshrl.u32 %v2099_v34, %v2431_v24  ;;  %v857_v52 = vshrl.u32 %v2102_v22, %v2431_v24  ;;  %v859_v10 = vshll.u32 %v2102_v22, %v844_v2 }
  0x5c   : > { %v987_v59 = vand.u32 2139095040, %v2207_v30  ;;  %v860_v62 = vshrl.u32 %v2103_v9, %v2431_v24  ;;  %v626_v4 = vclz %v625_v43  ;;  %v838_v5 = vor.u32 8388608, %v837_v41 }
  0x5d   : > { %v771_v45 = vadd.s32 1, %v767_v36  ;;  %v858_v7 = vor.u32 %v857_v52, %v856_v13  ;;  %v2466_v8 = vor.u32 %v851_v27, %v850_v20  ;;  %v2468_v12 = vor.u32 %v854_v28, %v853_v48 }
  0x5e   : > { %v861_v55 = vor.u32 %v860_v62, %v859_v10  ;;  %vm865_vm5 = vcmp.lt.s32.totalorder %v2442_v29, 4  ;;  %v2471_v56 = vor.u32 %v848_v57, %v847_v44  ;;  %vm862_vm6 = vcmp.lt.s32.totalorder %v2442_v29, 1 }
  0x5f   : > { %v772_v60 = vsel %vm770_vm4, %v771_v45, %v767_v36  ;;  %v988_v2 = vshrl.u32 %v987_v59, 23  ;;  %v1983_v61 = vadd.s32 4294967294, %v626_v4  ;;  %vm864_vm7 = vcmp.lt.s32.totalorder %v2442_v29, 3 }
  0x60   : > { %v773_v21 = vadd.s32 %v772_v60, %v768_v40  ;;  %v871_v16 = vsel %vm865_vm5, %v858_v7, 920167782  ;;  %vm863_vm8 = vcmp.lt.s32.totalorder %v2442_v29, 2  ;;  %v874_v11 = vsel %vm862_vm6, %v2466_v8, %v2468_v12 }
  0x61   : > { %v875_v17 = vsel %vm865_vm5, %v861_v55, 1326507024  ;;  %v2486_v54 = vshll.u32 %v838_v5, 8  ;;  %v870_v26 = vsel %vm862_vm6, %v2471_v56, %v2466_v8  ;;  %v872_v49 = vsel %vm864_vm7, %v2468_v12, %v871_v16 }
  0x62   : > { %v774_v39 = vadd.s32 536870912, %v773_v21  ;;  %v876_v37 = vsel %vm864_vm7, %v858_v7, %v875_v17  ;;  %v1991_v40 = vadd.s32 4294967169, %v988_v2  ;;  %vm1984_vm9 = vcmp.lt.s32.totalorder %v1983_v61, 0 }
  0x63   : > { %v879_v53 = vand.u32 65535, %v2486_v54  ;;  %v880_v36 = vshrl.u32 %v2486_v54, 16  ;;  %v877_v43 = vsel %vm863_vm8, %v874_v11, %v876_v37  ;;  %v873_v45 = vsel %vm863_vm8, %v870_v26, %v872_v49 }
  0x64   : > { %v2474_v51 = vshrl.u32 %v774_v39, 30  ;;  %v881_v20 = vand.u32 65535, %v877_v43  ;;  %v882_v27 = vshrl.u32 %v877_v43, 16  ;;  %v629_v48 = vsel %vm1984_vm9, 0, %v1983_v61 }
  0x65   : > { %v994_v57 = vadd.s32 1, %v1991_v40  ;;  %v904_v59 = vshrl.u32 %v873_v45, 16  ;;  %v634_v60 = vsub.s32 4294967266, %v629_v48  ;;  %v903_v7 = vand.u32 65535, %v873_v45 }
  0x66   : > { %v776_v41 = vshll.u32 %v2474_v51, 30  ;;  %v883_v28 = vmul.u32 %v881_v20, %v879_v53  ;;  %v884_v13 = vmul.u32 %v882_v27, %v879_v53  ;;  %v885_v44 = vmul.u32 %v881_v20, %v880_v36 }
  0x67   : > { %v886_v62 = vmul.u32 %v882_v27, %v880_v36  ;;  %vm995_vm11 = vcmp.gt.s32.totalorder %v994_v57, 0  ;;  %v614_v2 = vadd.s32 %v2354_v35, %v2378_v1  ;;  %v630_v61 = vsub.s32 32, %v629_v48 }
  0x68   : > { %v2504_v52 = vsub.s32 %v773_v21, %v776_v41  ;;  %v887_v10 = vshll.u32 %v884_v13, 16  ;;  %v889_v4 = vshll.u32 %v885_v44, 16  ;;  %v906_v21 = vmul.u32 %v904_v59, %v879_v53 }
  0x69   : > { %v635_v16 = vadd.s32 127, %v634_v60  ;;  %v907_v17 = vmul.u32 %v903_v7, %v880_v36  ;;  %v996_v26 = vsel %vm995_vm11, %v994_v57, 0  ;;  %v631_v40 = vshll.u32 %v2422_v50, %v629_v48 }
  0x6a   : > { %vm891_vm10 = vc.u32 %v883_v28, %v887_v10  ;;  %v893_v5 = vadd.s32 %v887_v10, %v883_v28  ;;  %v779_v55 = vsub.s32 0, %v2504_v52  ;;  %vm778_vm12 = vcmp.lt.s32.totalorder %v2504_v52, 0 }
  0x6b   : > { %v892_v39 = vsel %vm891_vm10, 1, %v2104_v15  ;;  %v632_v41 = vshrl.u32 %v614_v2, %v630_v61  ;;  %v905_v43 = vmul.u32 %v903_v7, %v879_v53  ;;  %v909_v20 = vshll.u32 %v906_v21, 16 }
  0x6c   : > { %v894_v11 = vadd.s32 %v892_v39, %v886_v62  ;;  %vm895_vm13 = vc.u32 %v893_v5, %v889_v4  ;;  %v780_v49 = vsel %vm778_vm12, %v779_v55, %v2504_v52  ;;  %v636_v27 = vshll.u32 %v635_v16, 23 }
  0x6d   : > { %v896_v37 = vsel %vm895_vm13, 1, %v2104_v15  ;;  %v888_v35 = vshrl.u32 %v884_v13, 16  ;;  %v781_v45 = vclz %v780_v49  ;;  %v908_v28 = vmul.u32 %v904_v59, %v880_v36 }
  0x6e   : > { %v898_v1 = vadd.s32 %v896_v37, %v894_v11  ;;  %v911_v10 = vshll.u32 %v907_v17, 16  ;;  %v998_v60 = vand.u32 31, %v996_v26  ;;  %v846_v62 = vshrl.u32 %v2098_v23, %v2431_v24 }
  0x6f   : > { %v633_v57 = vor.u32 %v632_v41, %v631_v40  ;;  %v867_v4 = vsel %vm865_vm5, %v2468_v12, 2102212464  ;;  %vm913_vm14 = vc.u32 %v905_v43, %v909_v20  ;;  %v915_v50 = vadd.s32 %v909_v20, %v905_v43 }
  0x70   : > { %v637_v48 = vor.u32 4788187, %v636_v27  ;;  %v890_v53 = vshrl.u32 %v885_v44, 16  ;;  %v899_v5 = vadd.s32 %v898_v1, %v888_v35  ;;  %v914_v13 = vsel %vm913_vm14, 1, %v2104_v15 }
  0x71   : > { %v1986_v7 = vadd.s32 4294967294, %v781_v45  ;;  %v910_v55 = vshrl.u32 %v906_v21, 16  ;;  %v916_v36 = vadd.s32 %v914_v13, %v908_v28  ;;  %vm917_vm15 = vc.u32 %v915_v50, %v911_v10 }
  0x72   : > { %v2520_v59 = vsub.s32 32, %v998_v60  ;;  %v866_v24 = vsel %vm862_vm6, %v846_v62, %v2471_v56  ;;  %v868_v12 = vsel %vm864_vm7, %v2466_v8, %v867_v4  ;;  %v918_v39 = vsel %vm917_vm15, 1, %v2104_v15 }
  0x73   : > { %v2529_v44 = vshrl.u32 %v996_v26, 5  ;;  %v912_v2 = vshrl.u32 %v907_v17, 16  ;;  %v920_v61 = vadd.s32 %v918_v39, %v916_v36  ;;  %v638_v16 = vand.u32 2147483647, %v637_v48 }
  0x74   : > { %v640_v21 = vcvt.s32.f32 %v633_v57  ;;  %v2531_v11 = vadd.s32 %v899_v5, %v890_v53  ;;  %v2533_v49 = vadd.s32 %v915_v50, %v911_v10  ;;  %vm1987_vm0 = vcmp.lt.s32.totalorder %v1986_v7, 0 }
  0x75   : > { %v869_v56 = vsel %vm863_vm8, %v866_v24, %v868_v12  ;;  %v921_v37 = vadd.s32 %v920_v61, %v910_v55  ;;  %v984_v40 = vand.u32 2147483647, %v2207_v30  ;;  %v1001_v8 = vshll.u32 %v2098_v23, %v998_v60 }
  0x76   : > { %v1002_v26 = vshrl.u32 %v2099_v34, %v2520_v59  ;;  %v1004_v17 = vshll.u32 %v2099_v34, %v998_v60  ;;  %v1005_v41 = vshrl.u32 %v2101_v47, %v2520_v59  ;;  %v1007_v20 = vshll.u32 %v2101_v47, %v998_v60 }
  0x77   : > { %v922_v43 = vadd.s32 %v921_v37, %v912_v2  ;;  %v1008_v29 = vshrl.u32 %v2100_v42, %v2520_v59  ;;  %v1010_v27 = vshll.u32 %v2100_v42, %v998_v60  ;;  %v923_v35 = vmul.u32 %v2486_v54, %v869_v56 }
  0x78   : > { %vm925_vm1 = vc.u32 %v2531_v11, %v2533_v49  ;;  %v1011_v1 = vshrl.u32 %v2102_v22, %v2520_v59  ;;  %v991_v45 = vand.u32 8388607, %v984_v40  ;;  %v1013_v28 = vshll.u32 %v2102_v22, %v998_v60 }
  0x79   : > { %v926_v34 = vadd.s32 1, %v922_v43  ;;  %v1014_v47 = vshrl.u32 %v2103_v9, %v2520_v59  ;;  %v641_v10 = vmul.f32 %v640_v21, %v638_v16  ;;  %v784_v42 = vsel %vm1987_vm0, 0, %v1986_v7 }
  0x7a   : > { %v2559_v62 = vor.u32 %v1002_v26, %v1001_v8  ;;  %v1012_v54 = vor.u32 %v1011_v1, %v1010_v27  ;;  %v2561_v4 = vor.u32 %v1005_v41, %v1004_v17  ;;  %v2563_v50 = vor.u32 %v1008_v29, %v1007_v20 }
  0x7b   : > { %v927_v57 = vsel %vm925_vm1, %v926_v34, %v922_v43  ;;  %vm1016_vm2 = vcmp.lt.s32.totalorder %v2529_v44, 1  ;;  %v1015_v53 = vor.u32 %v1014_v47, %v1013_v28  ;;  %vm1018_vm3 = vcmp.lt.s32.totalorder %v2529_v44, 3 }
  0x7c   : > { %v928_v48 = vadd.s32 %v927_v57, %v923_v35  ;;  %vm1019_vm4 = vcmp.lt.s32.totalorder %v2529_v44, 4  ;;  %vm522_vm5 = vcmp.lt.s32.totalorder %v2176_v3, 0  ;;  %v992_v22 = vor.u32 8388608, %v991_v45 }
  0x7d   : > { %v642_v9 = vxor.u32 2147483648, %v641_v10  ;;  %v789_v60 = vsub.s32 4294967266, %v784_v42  ;;  %v1025_v13 = vsel %vm1019_vm4, %v1012_v54, 920167782  ;;  %vm1017_vm6 = vcmp.lt.s32.totalorder %v2529_v44, 2 }
  0x7e   : > { %v929_v5 = vadd.s32 536870912, %v928_v48  ;;  %v1024_v7 = vsel %vm1016_vm2, %v2559_v62, %v2561_v4  ;;  %v1026_v55 = vsel %vm1018_vm3, %v2563_v50, %v1025_v13  ;;  %v1028_v36 = vsel %vm1016_vm2, %v2561_v4, %v2563_v50 }
  0x7f   : > { %vm2585_vm7 = vcmp.le.f32.partialorder %v520_v31, 0.7853982  ;;  %v1029_v39 = vsel %vm1019_vm4, %v1015_v53, 1326507024  ;;  %v769_v2 = vadd.s32 %v2439_v33, %v2437_v25  ;;  %v785_v61 = vsub.s32 32, %v784_v42 }
  0x80   : > { %v2589_v12 = vshrl.u32 %v929_v5, 30  ;;  %v1030_v16 = vsel %vm1018_vm3, %v1012_v54, %v1029_v39  ;;  %v2597_v21 = vshll.u32 %v992_v22, 8  ;;  %v643_v31 = vsel %vm522_vm5, %v642_v9, %v641_v10 }
  0x81   : > { %v1027_v37 = vsel %vm1017_vm6, %v1024_v7, %v1026_v55  ;;  %v1031_v8 = vsel %vm1017_vm6, %v1028_v36, %v1030_v16  ;;  %v790_v26 = vadd.s32 127, %v789_v60  ;;  %v2611_v20 = vsel %vm2585_vm7, %v2176_v3, %v643_v31 }
  0x82   : > { %v931_v56 = vshll.u32 %v2589_v12, 30  ;;  %v1033_v25 = vand.u32 65535, %v2597_v21  ;;  %v1034_v33 = vshrl.u32 %v2597_v21, 16  ;;  %v1035_v41 = vand.u32 65535, %v1031_v8 }
  0x83   : > { %v1036_v43 = vshrl.u32 %v1031_v8, 16  ;;  %v786_v29 = vshll.u32 %v2504_v52, %v784_v42  ;;  %v787_v27 = vshrl.u32 %v769_v2, %v785_v61  ;;  %v1058_v35 = vshrl.u32 %v1027_v37, 16 }
  0x84   : > { %v932_v17 = vsub.s32 %v928_v48, %v931_v56  ;;  %v1037_v34 = vmul.u32 %v1035_v41, %v1033_v25  ;;  %v791_v28 = vshll.u32 %v790_v26, 23  ;;  %v1039_v47 = vmul.u32 %v1035_v41, %v1034_v33 }
  0x85   : > { %v1038_v45 = vmul.u32 %v1036_v43, %v1033_v25  ;;  %v1040_v54 = vmul.u32 %v1036_v43, %v1034_v33  ;;  %v1057_v48 = vand.u32 65535, %v1027_v37  ;;  %v2616_v53 = vmul.f32 %v2611_v20, %v2611_v20 }
  0x86   : > { %vm933_vm8 = vcmp.lt.s32.totalorder %v932_v17, 0  ;;  %v934_v1 = vsub.s32 0, %v932_v17  ;;  %v788_v22 = vor.u32 %v787_v27, %v786_v29  ;;  %v1043_v60 = vshll.u32 %v1039_v47, 16 }
  0x87   : > { %v1041_v57 = vshll.u32 %v1038_v45, 16  ;;  %v1060_v42 = vmul.u32 %v1058_v35, %v1033_v25  ;;  %v649_v5 = vmul.f32 -0.001358992, %v2616_v53  ;;  %v792_v55 = vor.u32 4788187, %v791_v28 }
  0x88   : > { %v935_v10 = vsel %vm933_vm8, %v934_v1, %v932_v17  ;;  %v1061_v39 = vmul.u32 %v1057_v48, %v1034_v33  ;;  %v795_v2 = vcvt.s32.f32 %v788_v22  ;;  %v924_v61 = vadd.s32 %v2533_v49, %v2531_v11 }
  0x89   : > { %v936_v9 = vclz %v935_v10  ;;  %vm1045_vm9 = vc.u32 %v1037_v34, %v1041_v57  ;;  %v1047_v52 = vadd.s32 %v1041_v57, %v1037_v34  ;;  %v1059_v16 = vmul.u32 %v1057_v48, %v1033_v25 }
  0x8a   : > { %v1046_v7 = vsel %vm1045_vm9, 1, %v2104_v15  ;;  %v1042_v56 = vshrl.u32 %v1038_v45, 16  ;;  %v1063_v8 = vshll.u32 %v1060_v42, 16  ;;  %v1062_v29 = vmul.u32 %v1058_v35, %v1034_v33 }
  0x8b   : > { %v1989_v13 = vadd.s32 4294967294, %v936_v9  ;;  %v1048_v36 = vadd.s32 %v1046_v7, %v1040_v54  ;;  %vm1049_vm10 = vc.u32 %v1047_v52, %v1043_v60  ;;  %v793_v27 = vand.u32 2147483647, %v792_v55 }
  0x8c   : > { %v1050_v37 = vsel %vm1049_vm10, 1, %v2104_v15  ;;  %v1000_v1 = vshrl.u32 %v2098_v23, %v2520_v59  ;;  %v1065_v28 = vshll.u32 %v1061_v39, 16  ;;  %v656_v10 = vmul.f32 -0.00019511016, %v2616_v53 }
  0x8d   : > { %vm1990_vm11 = vcmp.lt.s32.totalorder %v1989_v13, 0  ;;  %v1052_v34 = vadd.s32 %v1050_v37, %v1048_v36  ;;  %vm1067_vm12 = vc.u32 %v1059_v16, %v1063_v8  ;;  %v1021_v25 = vsel %vm1019_vm4, %v2563_v50, 2102212464 }
  0x8e   : > { %v939_v31 = vsel %vm1990_vm11, 0, %v1989_v13  ;;  %v1044_v45 = vshrl.u32 %v1039_v47, 16  ;;  %v1069_v54 = vadd.s32 %v1063_v8, %v1059_v16  ;;  %v796_v23 = vmul.f32 %v795_v2, %v793_v27 }
  0x8f   : > { %v940_v26 = vsub.s32 32, %v939_v31  ;;  %v941_v41 = vshll.u32 %v932_v17, %v939_v31  ;;  %v944_v43 = vsub.s32 4294967266, %v939_v31  ;;  %v1068_v17 = vsel %vm1067_vm12, 1, %v2104_v15 }
  0x90   : > { %v1053_v57 = vadd.s32 %v1052_v34, %v1042_v56  ;;  %v1070_v48 = vadd.s32 %v1068_v17, %v1062_v29  ;;  %v1020_v59 = vsel %vm1016_vm2, %v1000_v1, %v2559_v62  ;;  %v1064_v22 = vshrl.u32 %v1060_v42, 16  ;;  %v2646_v56 = vld [vmem:[%s2173_s11 + $0x8] sm:$0x7f] }
  0x91   : > { %v942_v11 = vshrl.u32 %v924_v61, %v940_v26  ;;  %v945_v49 = vadd.s32 127, %v944_v43  ;;  %vm1071_vm13 = vc.u32 %v1069_v54, %v1065_v28  ;;  %v1022_v50 = vsel %vm1018_vm3, %v2561_v4, %v1021_v25 }
  0x92   : > { %v1072_v47 = vsel %vm1071_vm13, 1, %v2104_v15  ;;  %v657_v52 = vadd.f32 0.008332121, %v656_v10  ;;  %v1066_v13 = vshrl.u32 %v1061_v39, 16  ;;  %v2637_v36 = vadd.s32 %v1053_v57, %v1044_v45  ;;  %v2650_v39 = vld [vmem:[%s2186_s14] sm:$0x7f] }
  0x93   : > { %v943_v33 = vor.u32 %v942_v11, %v941_v41  ;;  %v946_v35 = vshll.u32 %v945_v49, 23  ;;  %v1074_v7 = vadd.s32 %v1072_v47, %v1070_v48  ;;  %v2639_v2 = vadd.s32 %v1069_v54, %v1065_v28 }
  0x94   : > { %v650_v62 = vadd.f32 0.041655596, %v649_v5  ;;  %v1023_v42 = vsel %vm1017_vm6, %v1020_v59, %v1022_v50  ;;  %v644_v16 = vsub.s32 4, %v2412_v32  ;;  %v797_v31 = vxor.u32 2147483648, %v796_v23 }
  0x95   : > { %v947_v9 = vor.u32 4788187, %v946_v35  ;;  %v950_v60 = vcvt.s32.f32 %v943_v33  ;;  %v1075_v61 = vadd.s32 %v1074_v7, %v1064_v22  ;;  %v658_v15 = vmul.f32 %v657_v52, %v2616_v53 }
  0x96   : > { %vm677_vm14 = vcmp.lt.s32.totalorder %v2646_v56, 0  ;;  %vm832_vm15 = vcmp.lt.s32.totalorder %v2650_v39, 0  ;;  %vm2655_vm0 = vcmp.le.f32.partialorder %v830_v38, 0.7853982  ;;  %v1077_v8 = vmul.u32 %v2597_v21, %v1023_v42 }
  0x97   : > { %v948_v55 = vand.u32 2147483647, %v947_v9  ;;  %v1076_v37 = vadd.s32 %v1075_v61, %v1066_v13  ;;  %vm1079_vm1 = vc.u32 %v2637_v36, %v2639_v2  ;;  %v651_v26 = vmul.f32 %v650_v62, %v2616_v53 }
  0x98   : > { %vm2665_vm2 = vcmp.le.f32.partialorder %v675_v58, 0.7853982  ;;  %v798_v14 = vsel %vm677_vm14, %v797_v31, %v796_v23  ;;  %v659_v29 = vadd.f32 -0.16666654, %v658_v15  ;;  %v645_v6 = vsel %vm522_vm5, %v644_v16, %v2412_v32 }
  0x99   : > { %v951_v4 = vmul.f32 %v950_v60, %v948_v55  ;;  %v1080_v41 = vadd.s32 1, %v1076_v37  ;;  %v652_v34 = vadd.f32 -0.4999988, %v651_v26  ;;  %v2682_v28 = vsel %vm2665_vm2, %v2646_v56, %v798_v14 }
  0x9a   : > { %v647_v25 = vsel %vm2585_vm7, 0, %v645_v6  ;;  %v660_v45 = vmul.f32 %v659_v29, %v2616_v53  ;;  %v2689_v3 = vmul.f32 %v2682_v28, %v2682_v28  ;;  %v799_v24 = vsub.s32 4, %v2474_v51  ;;  %v2070_v6 = vld [vmem:[%s2173_s11] sm:$0x7f] }
  0x9b   : > { %v952_v5 = vxor.u32 2147483648, %v951_v4  ;;  %v1081_v27 = vsel %vm1079_vm1, %v1080_v41, %v1076_v37  ;;  %v653_v33 = vmul.f32 %v652_v34, %v2616_v53  ;;  %v664_v59 = vadd.s32 3, %v647_v25 }
  0x9c   : > { %v1082_v1 = vadd.s32 %v1081_v27, %v1077_v8  ;;  %v661_v23 = vadd.f32 1.0, %v660_v45  ;;  %v804_v22 = vmul.f32 -0.001358992, %v2689_v3  ;;  %v811_v9 = vmul.f32 -0.00019511016, %v2689_v3 }
  0x9d   : > { %v953_v38 = vsel %vm832_vm15, %v952_v5, %v951_v4  ;;  %v954_v47 = vsub.s32 4, %v2589_v12  ;;  %v654_v13 = vadd.f32 1.0, %v653_v33  ;;  %v2700_v62 = vand.u32 3, %v664_v59 }
  0x9e   : > { %v956_v21 = vsel %vm2655_vm0, %v2650_v39, %v953_v38  ;;  %v1083_v49 = vadd.s32 536870912, %v1082_v1  ;;  %v662_v55 = vmul.f32 %v661_v23, %v2611_v20  ;;  %v800_v42 = vsel %vm677_vm14, %v799_v24, %v2474_v51 }
  0x9f   : > { %v958_v58 = vmul.f32 %v956_v21, %v956_v21  ;;  %v805_v61 = vadd.f32 0.041655596, %v804_v22  ;;  %v812_v16 = vadd.f32 0.008332121, %v811_v9  ;;  %v955_v4 = vsel %vm832_vm15, %v954_v47, %v2589_v12 }
  0xa0   : > { %v2691_v54 = vshrl.u32 %v1083_v49, 30  ;;  %v671_v8 = vxor.u32 2147483648, %v654_v13  ;;  %vm667_vm4 = vcmp.eq.s32.totalorder %v2700_v62, 0  ;;  %v668_v20 = vxor.u32 2147483648, %v662_v55 }
  0xa1   : > { %v959_v10 = vmul.f32 -0.001358992, %v958_v58  ;;  %v966_v11 = vmul.f32 -0.00019511016, %v958_v58  ;;  %vm670_vm5 = vcmp.eq.s32.totalorder %v2700_v62, 2  ;;  %v2712_v51 = vsel %vm2665_vm2, 0, %v800_v42 }
  0xa2   : > { %v1085_v48 = vshll.u32 %v2691_v54, 30  ;;  %v806_v41 = vmul.f32 %v805_v61, %v2689_v3  ;;  %v813_v14 = vmul.f32 %v812_v16, %v2689_v3  ;;  %v957_v12 = vsel %vm2655_vm0, 0, %v955_v4 }
  0xa3   : > { %v960_v32 = vadd.f32 0.041655596, %v959_v10  ;;  %v967_v17 = vadd.f32 0.008332121, %v966_v11  ;;  %vm666_vm6 = vcmp.lt.s32.totalorder %v2700_v62, 2  ;;  %v1078_v27 = vadd.s32 %v2639_v2, %v2637_v36 }
  0xa4   : > { %v1086_v50 = vsub.s32 %v1082_v1, %v1085_v48  ;;  %vm663_vm8 = vweird.f32 %v2070_v6  ;;  %v672_v43 = vsel %vm670_vm5, %v671_v8, %v662_v55  ;;  %v1284_v34 = vand.u32 3, %v647_v25 }
  0xa5   : > { %v961_v35 = vmul.f32 %v960_v32, %v958_v58  ;;  %v968_v57 = vmul.f32 %v967_v17, %v958_v58  ;;  %v669_v10 = vsel %vm667_vm4, %v654_v13, %v668_v20  ;;  %v807_v45 = vadd.f32 -0.4999988, %v806_v41 }
  0xa6   : > { %vm1087_vm3 = vcmp.lt.s32.totalorder %v1086_v50, 0  ;;  %v1088_v53 = vsub.s32 0, %v1086_v50  ;;  %v814_v32 = vadd.f32 -0.16666654, %v813_v14  ;;  %vm1286_vm9 = vcmp.eq.s32.totalorder %v1284_v34, 0 }
  0xa7   : > { %v969_v60 = vadd.f32 -0.16666654, %v968_v57  ;;  %v962_v52 = vadd.f32 -0.4999988, %v961_v35  ;;  %vm1285_vm12 = vcmp.lt.s32.totalorder %v1284_v34, 2  ;;  %vm1289_vm13 = vcmp.eq.s32.totalorder %v1284_v34, 2 }
  0xa8   : > { %v1089_v31 = vsel %vm1087_vm3, %v1088_v53, %v1086_v50  ;;  %v1288_v57 = vsel %vm1286_vm9, %v654_v13, %v668_v20  ;;  %v1291_v48 = vsel %vm1289_vm13, %v671_v8, %v662_v55  ;;  %v815_v23 = vmul.f32 %v814_v32, %v2689_v3 }
  0xa9   : > { %v970_v7 = vmul.f32 %v969_v60, %v958_v58  ;;  %v963_v15 = vmul.f32 %v962_v52, %v958_v58  ;;  %v1090_v5 = vclz %v1089_v31  ;;  %v974_v58 = vand.u32 3, %v957_v12 }
  0xaa   : > { %vm973_vm14 = vweird.f32 %v2650_v39  ;;  %v673_v13 = vsel %vm666_vm6, %v669_v10, %v672_v43  ;;  %v819_v53 = vadd.s32 3, %v2712_v51  ;;  %v808_v4 = vmul.f32 %v807_v45, %v2689_v3 }
  0xab   : > { %v971_v37 = vadd.f32 1.0, %v970_v7  ;;  %v1992_v26 = vadd.s32 4294967294, %v1090_v5  ;;  %v964_v38 = vadd.f32 1.0, %v963_v15  ;;  %vm976_vm10 = vcmp.eq.s32.totalorder %v974_v58, 0 }
  0xac   : > { %vm979_vm11 = vcmp.eq.s32.totalorder %v974_v58, 2  ;;  %vm975_vm15 = vcmp.lt.s32.totalorder %v974_v58, 2  ;;  %v816_v15 = vadd.f32 1.0, %v815_v23  ;;  %v1108_v62 = vsub.s32 4, %v2691_v54 }
  0xad   : > { %v972_v29 = vmul.f32 %v971_v37, %v956_v21  ;;  %vm1993_vm7 = vcmp.lt.s32.totalorder %v1992_v26, 0  ;;  %v1592_v21 = vadd.s32 3, %v957_v12  ;;  %v980_v33 = vxor.u32 2147483648, %v964_v38  ;;  %v2735_v37 = vld [vmem:[%s2186_s14 + $0x8] sm:$0x7f] }
  0xae   : > { %v1093_v1 = vsel %vm1993_vm7, 0, %v1992_v26  ;;  %vm986_vm3 = vcmp.lt.s32.totalorder %v2735_v37, 0  ;;  %vm985_vm4 = vcmp.le.f32.partialorder %v984_v40, 0.7853982  ;;  %v674_v8 = vsel %vm663_vm8, nan, %v673_v13 }
  0xaf   : > { %v1094_v11 = vsub.s32 32, %v1093_v1  ;;  %v1095_v44 = vshll.u32 %v1086_v50, %v1093_v1  ;;  %v1098_v49 = vsub.s32 4294967266, %v1093_v1  ;;  %v977_v17 = vxor.u32 2147483648, %v972_v29  ;;  %v442_v23 = vpop.xlane.xlu0 %441 }
  0xb0   : > { %v1593_v59 = vand.u32 3, %v1592_v21  ;;  %v981_v22 = vsel %vm979_vm11, %v980_v33, %v972_v29  ;;  %v1292_v50 = vsel %vm1285_vm12, %v1288_v57, %v1291_v48  ;;  %v820_v41 = vand.u32 3, %v819_v53 }
  0xb1   : > { %v1096_v36 = vshrl.u32 %v1078_v27, %v1094_v11  ;;  %v1099_v2 = vadd.s32 127, %v1098_v49  ;;  %v978_v24 = vsel %vm976_vm10, %v964_v38, %v977_v17  ;;  %v1293_v16 = vsel %vm663_vm8, nan, %v1292_v50 }
  0xb2   : > { %vm1594_vm0 = vcmp.lt.s32.totalorder %v1593_v59, 2  ;;  %vm1595_vm1 = vcmp.eq.s32.totalorder %v1593_v59, 0  ;;  %vm1598_vm2 = vcmp.eq.s32.totalorder %v1593_v59, 2  ;;  %v982_v42 = vsel %vm975_vm15, %v978_v24, %v981_v22  ;;  %v512_v59 = vpop.xlane.xlu1 %511 }
  0xb3   : > { %v1097_v35 = vor.u32 %v1096_v36, %v1095_v44  ;;  %v1100_v25 = vshll.u32 %v1099_v2, 23  ;;  %v1597_v52 = vsel %vm1595_vm1, %v964_v38, %v977_v17  ;;  %v1600_v7 = vsel %vm1598_vm2, %v980_v33, %v972_v29 }
  0xb4   : > { %v1601_v55 = vsel %vm1594_vm0, %v1597_v52, %v1600_v7  ;;  %v983_v20 = vsel %vm973_vm14, nan, %v982_v42  ;;  %v809_v3 = vadd.f32 1.0, %v808_v4  ;;  %v817_v12 = vmul.f32 %v816_v15, %v2682_v28 }
  0xb5   : > { %v1101_v9 = vor.u32 4788187, %v1100_v25  ;;  %v1104_v60 = vcvt.s32.f32 %v1097_v35  ;;  %v1602_v31 = vsel %vm973_vm14, nan, %v1601_v55  ;;  %v1109_v38 = vsel %vm986_vm3, %v1108_v62, %v2691_v54 }
  0xb6   : > { %v1758_v26 = vmul.f32 %v1602_v31, %v1293_v16  ;;  %v1138_v43 = vmul.f32 %v983_v20, %v674_v8  ;;  %v1111_v30 = vsel %vm985_vm4, 0, %v1109_v38  ;;  %vm822_vm6 = vcmp.eq.s32.totalorder %v820_v41, 0 }
  0xb7   : > { %v1102_v47 = vand.u32 2147483647, %v1101_v9  ;;  %v823_v58 = vxor.u32 2147483648, %v817_v12  ;;  %vm825_vm7 = vcmp.eq.s32.totalorder %v820_v41, 2  ;;  %v826_v39 = vxor.u32 2147483648, %v809_v3 }
  0xb8   : > { %vm1760_vm5 = vcmp.ne.f32.partialorder %v1758_v26, %v1758_v26  ;;  %v1438_v10 = vand.u32 3, %v2712_v51  ;;  %v1747_v28 = vadd.s32 3, %v1111_v30  ;;  %vm821_vm8 = vcmp.lt.s32.totalorder %v820_v41, 2 }
  0xb9   : > { %v1105_v61 = vmul.f32 %v1104_v60, %v1102_v47  ;;  %v1762_v11 = vsel %vm1760_vm5, %v1138_v43, %v1758_v26  ;;  %v824_v49 = vsel %vm822_vm6, %v809_v3, %v823_v58  ;;  %v827_v45 = vsel %vm825_vm7, %v826_v39, %v817_v12 }
  0xba   : > { %v1128_v32 = vand.u32 3, %v1111_v30  ;;  %v1764_v21 = vsub.f32 %v1138_v43, %v1762_v11  ;;  %vm1440_vm9 = vcmp.eq.s32.totalorder %v1438_v10, 0  ;;  %vm1443_vm10 = vcmp.eq.s32.totalorder %v1438_v10, 2 }
  0xbb   : > { %v1106_v5 = vxor.u32 2147483648, %v1105_v61  ;;  %v1748_v36 = vand.u32 3, %v1747_v28  ;;  %vm818_vm11 = vweird.f32 %v2646_v56  ;;  %v828_v2 = vsel %vm821_vm8, %v824_v49, %v827_v45 }
  0xbc   : > { %vm1439_vm12 = vcmp.lt.s32.totalorder %v1438_v10, 2  ;;  %v1442_v51 = vsel %vm1440_vm9, %v809_v3, %v823_v58  ;;  %v1445_v57 = vsel %vm1443_vm10, %v826_v39, %v817_v12  ;;  %v1766_v48 = vand.u32 2147483647, %v1764_v21 }
  0xbd   : > { %v1107_v14 = vsel %vm986_vm3, %v1106_v5, %v1105_v61  ;;  %vm1129_vm13 = vcmp.lt.s32.totalorder %v1128_v32, 2  ;;  %v443_v9 = vrot.slane %v442_v23, 4  ;;  %vm1130_vm14 = vcmp.eq.s32.totalorder %v1128_v32, 0 }
  0xbe   : > { %v1110_v29 = vsel %vm985_vm4, %v2735_v37, %v1107_v14  ;;  %vm1133_vm15 = vcmp.eq.s32.totalorder %v1128_v32, 2  ;;  %vm1753_vm0 = vcmp.eq.s32.totalorder %v1748_v36, 2  ;;  %v513_v60 = vrot.slane %v512_v59, 4  ;;  %v457_v14 = vpop.xlane.xlu0 %456 }
  0xbf   : > { %v1112_v27 = vmul.f32 %v1110_v29, %v1110_v29  ;;  %v1446_v52 = vsel %vm1439_vm12, %v1442_v51, %v1445_v57  ;;  %v444_v7 = vadd.f32 %v443_v9, %v442_v23  ;;  %vm1749_vm1 = vcmp.lt.s32.totalorder %v1748_v36, 2 }
  0xc0   : > { %vm1750_vm2 = vcmp.eq.s32.totalorder %v1748_v36, 0  ;;  %v1770_v13 = vmul.f32 0.5, %v1766_v48  ;;  %v514_v53 = vadd.f32 %v513_v60, %v512_v59  ;;  %v829_v31 = vsel %vm818_vm11, nan, %v828_v2 }
  0xc1   : > { %v1113_v40 = vmul.f32 -0.001358992, %v1112_v27  ;;  %v1120_v6 = vmul.f32 -0.00019511016, %v1112_v27  ;;  %v445_v16 = vrot.slane %v444_v7, 2  ;;  %vm1127_vm3 = vweird.f32 %v2735_v37 }
  0xc2   : > { %v515_v4 = vrot.slane %v514_v53, 2  ;;  %v1447_v62 = vsel %vm818_vm11, nan, %v1446_v52  ;;  %v1772_v41 = vmul.f32 %v1770_v13, %v1766_v48  ;;  %v458_v38 = vrot.slane %v457_v14, 4 }
  0xc3   : > { %v1114_v1 = vadd.f32 0.041655596, %v1113_v40  ;;  %v1121_v34 = vadd.f32 0.008332121, %v1120_v6  ;;  %v446_v8 = vadd.f32 %v445_v16, %v444_v7  ;;  %v2006_v6 = vadd.f32 -0.055555556, %v1766_v48 }
  0xc4   : > { %v516_v43 = vadd.f32 %v515_v4, %v514_v53  ;;  %v459_v30 = vadd.f32 %v458_v38, %v457_v14  ;;  %v1774_v56 = vmul.f32 %v1772_v41, %v2282_v46  ;;  %vm1768_vm5 = vcmp.lt.f32.partialorder %v1766_v48, 0.11111111 }
  0xc5   : > { %v1115_v54 = vmul.f32 %v1114_v1, %v1112_v27  ;;  %v1122_v44 = vmul.f32 %v1121_v34, %v1112_v27  ;;  %vm1788_vm7 = vcmask 516096   ;;  %vm379_vm8 = vcmask 0  }
  0xc6   : > { %v460_v39 = vrot.slane %v459_v30, 2  ;;  %v517_v34 = vrot.slane %v516_v43, 1  ;;  %v1778_v28 = vsel %vm1768_vm5, %v1774_v56, %v2006_v6  ;;  %380 = vst.msk [vmem:[%s368_s17] sm:$0x1] %vm379_vm8, %v2096_v18 }
  0xc7   : > { %v1116_v17 = vadd.f32 -0.4999988, %v1115_v54  ;;  %v1123_v33 = vadd.f32 -0.16666654, %v1122_v44  ;;  %v1780_v45 = vmul.f32 %v1778_v28, %v501_v63  ;;  %382 = vst.msk [vmem:[%s374_s20] sm:$0x1] %vm379_vm8, %v2096_v18 }
  0xc8   : > { %v461_v10 = vadd.f32 %v460_v39, %v459_v30  ;;  %v518_v49 = vadd.f32 %v517_v34, %v516_v43  ;;  %381 = vst.msk [vmem:[%s371_s27] sm:$0x1] %vm379_vm8, %v2096_v18 }
  0xc9   : > { %v1117_v35 = vmul.f32 %v1116_v17, %v1112_v27  ;;  %v1124_v25 = vmul.f32 %v1123_v33, %v1112_v27  ;;  %v1784_v36 = vrot.slane %v1780_v45, 6 }
  0xca   : > { %v462_v54 = vrot.slane %v461_v10, 1 }
  0xcb   : > { %v1118_v24 = vadd.f32 1.0, %v1117_v35  ;;  %v1125_v22 = vadd.f32 1.0, %v1124_v25  ;;  %v1789_v51 = vsel %vm1788_vm7, %v1784_v36, 0.0 }
  0xcc   : > { %v463_v32 = vadd.f32 %v462_v54, %v461_v10 }
  0xcd   : > { %v1126_v50 = vmul.f32 %v1125_v22, %v1110_v29  ;;  %v1134_v47 = vxor.u32 2147483648, %v1118_v24  ;;  %v447_v29 = vrot.slane %v446_v8, 1  ;;  %v434_v57 = vld [vmem:[%s368_s17] sm:$0x1] }
  0xce   : > { %v454_v23 = vld [vmem:[%s374_s20] sm:$0x1] }
  0xcf   : > { %v1131_v55 = vxor.u32 2147483648, %v1126_v50  ;;  %v1135_v42 = vsel %vm1133_vm15, %v1134_v47, %v1126_v50  ;;  %v1755_v61 = vsel %vm1753_vm0, %v1134_v47, %v1126_v50  ;;  %v448_v40 = vadd.f32 %v447_v29, %v446_v8  ;;  %v1802_v18 = vld [vmem:[%s371_s27] sm:$0x1] }
  0xd1   : > { %v1132_v15 = vsel %vm1130_vm14, %v1118_v24, %v1131_v55  ;;  %v1752_v5 = vsel %vm1750_vm2, %v1118_v24, %v1131_v55  ;;  %2017 = vpush %v448_v40 }
  0xd2   : > { %v1136_v20 = vsel %vm1129_vm13, %v1132_v15, %v1135_v42  ;;  %v1756_v26 = vsel %vm1749_vm1, %v1752_v5, %v1755_v61  ;;  %2019 = vpush %v463_v32 }
  0xd3   : > { %v1137_v3 = vsel %vm1127_vm3, nan, %v1136_v20  ;;  %v1757_v12 = vsel %vm1127_vm3, nan, %v1756_v26  ;;  %2021 = vpush %v518_v49 }
  0xd4   : > { %v1139_v27 = vmul.f32 %v1137_v3, %v829_v31  ;;  %v1759_v37 = vmul.f32 %v1757_v12, %v1447_v62 }
  0xd6   : > { %vm1761_vm4 = vcmp.ne.f32.partialorder %v1759_v37, %v1759_v37 }
  0xd7   : > { %v1763_v58 = vsel %vm1761_vm4, %v1139_v27, %v1759_v37 }
  0xd8   : > { %v1765_v1 = vsub.f32 %v1139_v27, %v1763_v58 }
  0xda   : > { %v1767_v11 = vand.u32 2147483647, %v1765_v1 }
  0xdc   : > { %v1771_v44 = vmul.f32 0.5, %v1767_v11  ;;  %v2007_v17 = vadd.f32 -0.055555556, %v1767_v11  ;;  %vm1769_vm6 = vcmp.lt.f32.partialorder %v1767_v11, 0.11111111 }
  0xde   : > { %v1773_v21 = vmul.f32 %v1771_v44, %v1767_v11 }
  0xe0   : > { %v1775_v33 = vmul.f32 %v1773_v21, %v2282_v46 }
  0xe2   : > { %v1779_v2 = vsel %vm1769_vm6, %v1775_v33, %v2007_v17 }
  0xe3   : > { %v1781_v35 = vmul.f32 %v1779_v2, %v2247_v0 }
  0xe5   : > { %v1785_v25 = vrot.slane %v1781_v35, 6 }
  0xe7   : > { %v1790_v19 = vsel %vm1788_vm7, %v1785_v25, 0.0 }
  0xe8   : > { %v1791_v63 = vadd.f32 %v1790_v19, %v1789_v51 }
  0xea   : > { %1792 = vadd.xlane.f32.xlu1 %v1791_v63 }
 0x102   : > { %s2018_s28 = spop %2017 }
 0x103   : > { %v450_v0 = vstv %s2018_s28  ;;  %s2020_s29 = spop %2019 }
 0x104   : > { %v465_v46 = vstv %s2020_s29  ;;  %v451_v48 = vadd.f32 %v450_v0, %v434_v57  ;;  %s2022_s21 = spop %2021 }
 0x105   : > { %v466_v59 = vadd.f32 %v465_v46, %v454_v23 }
 0x106   : > { %453 = vst.msk [vmem:[%s368_s17] sm:$0x1] %vm379_vm8, %v451_v48 }
 0x107   : > { %467 = vst.msk [vmem:[%s374_s20] sm:$0x1] %vm379_vm8, %v466_v59 }
 0x15d   : > { %v1793_v24 = vpop.xlane.xlu1 %1792 }
 0x15e   : > { %v1794_v22 = vrot.slane %v1793_v24, 4 }
 0x160   : > { %v1795_v9 = vadd.f32 %v1794_v22, %v1793_v24 }
 0x162   : > { %v1796_v60 = vrot.slane %v1795_v9, 2 }
 0x164   : > { %v1797_v50 = vadd.f32 %v1796_v60, %v1795_v9 }
 0x166   : > { %v1798_v47 = vrot.slane %v1797_v50, 1 }
 0x168   : > { %v1799_v52 = vadd.f32 %v1798_v47, %v1797_v50 }
 0x16a   : > { %2023 = vpush %v1799_v52 }
 0x19b   : > { %s2024_s30 = spop %2023 }
 0x19c   : > { %s1801_s7 = sadd.f32 %s2024_s30, %s2022_s21 }
 0x19e   : > { %v1803_v7 = vstv %s1801_s7 }
 0x19f   : > { %v1804_v13 = vadd.f32 %v1803_v7, %v1802_v18 }
 0x1a1   : > { %1805 = vst.msk [vmem:[%s371_s27] sm:$0x1] %vm379_vm8, %v1804_v13 }
 0x1a2 PF: > { %s17_s23 = sadd.s32 1, %s2094_s23   ;;  %s2810_s21 = smov %s2090_s22 }
 0x1a3   : > { %p14_p5 = scmp.ge.s32.totalorder %s17_s23, 4   ;;  %s2811_s22 = smov %s2813_s24 }
 0x1a5   :  { %16 = sbr.rel (!%p14_p5) target bundleno = 2 (0x2), region = 103 }

</bundles_post_ra>
